<compile_context>
chip_gen: v6e
topology: v6e:2x2x1
jax: 0.10.0
libtpu: 0.0.40
codegen_flags: <defaults>
</compile_context>

<pallas_src>
import jax
import jax.numpy as jnp
from jax.experimental import pallas as pl
from jax.experimental.pallas import tpu as pltpu

NUM_CLASSES = 6
VIS_DIM = 1280
AUD_DIM = 128
FUSE_DIM = VIS_DIM + AUD_DIM      # 1408
HID = 512
NC_PAD = 128                      # pad class dim to a full lane tile; slice after
BN_EPS = 1e-5


# ---------------------------------------------------------------- kernel ----
def fusion_kernel(vis_ref, aud_ref,
                  w1v_ref, w1a_ref, b1_ref,
                  w2_ref, b2_ref,
                  w3_ref, b3_ref,
                  out_ref):
    # layer 1: split matmul replaces cat(vis, aud) @ w1; bn1/bn2 pre-folded.
    # inputs already bf16 -> no in-kernel cast for the activation streams.
    h = jnp.dot(vis_ref[...], w1v_ref[...], preferred_element_type=jnp.float32)
    h = h + jnp.dot(aud_ref[...], w1a_ref[...],
                    preferred_element_type=jnp.float32)
    h = jnp.maximum(h + b1_ref[...], 0.0)
    # layer 2 (bn3 folded into w2/b2)
    h = jnp.dot(h.astype(jnp.bfloat16), w2_ref[...],
                preferred_element_type=jnp.float32)
    h = jnp.maximum(h + b2_ref[...], 0.0)
    # layer 3 (class dim zero-padded to 128 lanes -> unmasked, lane-dense store)
    y = jnp.dot(h.astype(jnp.bfloat16), w3_ref[...],
                preferred_element_type=jnp.float32)
    out_ref[...] = y + b3_ref[...]


# ----------------------------------------------------------- param prep -----
def fold_bn(gamma, beta, mean, var, eps=BN_EPS):
    scale = gamma / jnp.sqrt(var + eps)
    shift = beta - mean * scale
    return scale, shift


def init_raw_params(key):
    """Raw (unfolded) parameters mirroring the PyTorch module in eval mode."""
    ks = jax.random.split(key, 12)
    p = {}
    # BatchNorm1d(1408): (gamma, beta, running_mean, running_var)
    p["bn1"] = (1.0 + 0.1 * jax.random.normal(ks[0], (FUSE_DIM,)),
                0.1 * jax.random.normal(ks[1], (FUSE_DIM,)),
                0.1 * jax.random.normal(ks[2], (FUSE_DIM,)),
                0.5 + jax.nn.softplus(jax.random.normal(ks[3], (FUSE_DIM,))))
    # Linear(1408, 512) stored as (in, out)
    p["w1"] = 0.02 * jax.random.normal(ks[4], (FUSE_DIM, HID), jnp.float32)
    p["b1"] = 0.01 * jax.random.normal(ks[5], (HID,), jnp.float32)
    # BatchNorm1d(512) x2
    p["bn2"] = (jnp.ones((HID,)), jnp.zeros((HID,)),
                jnp.zeros((HID,)), jnp.ones((HID,)))
    p["bn3"] = (1.0 + 0.05 * jax.random.normal(ks[6], (HID,)),
                0.05 * jax.random.normal(ks[7], (HID,)),
                jnp.zeros((HID,)), jnp.ones((HID,)))
    # Linear(512, 512)
    p["w2"] = 0.02 * jax.random.normal(ks[8], (HID, HID), jnp.float32)
    p["b2"] = 0.01 * jax.random.normal(ks[9], (HID,), jnp.float32)
    # Linear(512, num_classes)
    p["w3"] = 0.02 * jax.random.normal(ks[10], (HID, NUM_CLASSES), jnp.float32)
    p["b3"] = 0.01 * jax.random.normal(ks[11], (NUM_CLASSES,), jnp.float32)
    return p


def prep_params(raw):
    """Fold eval-mode BNs into the Linears, split w1, cast weights to bf16."""
    s1, t1 = fold_bn(*raw["bn1"])
    s2, t2 = fold_bn(*raw["bn2"])
    s3, t3 = fold_bn(*raw["bn3"])
    # bn1 (input) and bn2 (output) folded into linear1
    w1f = (s1[:, None] * raw["w1"]) * s2[None, :]
    b1f = (t1 @ raw["w1"] + raw["b1"]) * s2 + t2
    # bn3 (output) folded into linear2
    w2f = raw["w2"] * s3[None, :]
    b2f = raw["b2"] * s3 + t3
    # linear3: pad class dim to a full 128-lane tile
    w3p = jnp.pad(raw["w3"], ((0, 0), (0, NC_PAD - NUM_CLASSES)))
    b3p = jnp.pad(raw["b3"], (0, NC_PAD - NUM_CLASSES))
    return {
        "w1v": w1f[:VIS_DIM].astype(jnp.bfloat16),      # (1280, 512)
        "w1a": w1f[VIS_DIM:].astype(jnp.bfloat16),      # (128, 512)
        "b1": b1f.reshape(1, -1).astype(jnp.float32),   # (1, 512)
        "w2": w2f.astype(jnp.bfloat16),                 # (512, 512)
        "b2": b2f.reshape(1, -1).astype(jnp.float32),   # (1, 512)
        "w3": w3p.astype(jnp.bfloat16),                 # (512, 128)
        "b3": b3p.reshape(1, -1).astype(jnp.float32),   # (1, 128)
    }


# ------------------------------------------------------ tile-size policy ----
def _pick_tile(B, candidates=(512, 256, 128, 64)):
    """Choose (TB, B_pad).

    - batch rounded up to a sublane multiple (8),
    - tiny batches (< 32 rows): single step, block == full array,
    - otherwise TB is a multiple of 16 (bf16 sublane packing), capped so the
      grid has >= 2 steps (v7x megacore), and picked from `candidates` to
      minimize tail padding (tie-break: larger tile to fill the MXU).
    """
    b8 = max(8, -(-B // 8) * 8)
    if b8 < 32:
        return b8, b8
    cap = max(16, (b8 // 2) // 16 * 16)        # >= 2 grid steps
    cands = [t for t in candidates if t <= cap] or [cap]
    best_tb, best_pad = None, None
    for tb in cands:
        b_pad = -(-b8 // tb) * tb
        if best_pad is None or (b_pad, -tb) < (best_pad, -best_tb):
            best_tb, best_pad = tb, b_pad
    return best_tb, best_pad


# -------------------------------------------------------------- wrapper -----
def fusion_head(vis_feat, aud_feat, pp):
    B = vis_feat.shape[0]
    TB, B_pad = _pick_tile(B)

    # bf16 activation streams (no-op cast if the backbone already emits bf16)
    vis_p = jnp.pad(vis_feat.astype(jnp.bfloat16), ((0, B_pad - B), (0, 0)))
    aud_p = jnp.pad(aud_feat.astype(jnp.bfloat16), ((0, B_pad - B), (0, 0)))

    def act_spec(d):
        return pl.BlockSpec((TB, d), lambda i: (i, 0))

    def resident(shape):      # same block every step -> stays VMEM-resident
        return pl.BlockSpec(shape, lambda i: (0, 0))

    # scale the VMEM budget with the batch tile (resident data is small,
    # but larger tiles need room for double-buffered activations + f32 temps)
    vmem_limit = (32 << 20) if TB > 128 else (16 << 20)

    out = pl.pallas_call(
        fusion_kernel,
        out_shape=jax.ShapeDtypeStruct((B_pad, NC_PAD), jnp.float32),
        grid=(B_pad // TB,),
        in_specs=[
            act_spec(VIS_DIM), act_spec(AUD_DIM),
            resident((VIS_DIM, HID)), resident((AUD_DIM, HID)), resident((1, HID)),
            resident((HID, HID)), resident((1, HID)),
            resident((HID, NC_PAD)), resident((1, NC_PAD)),
        ],
        out_specs=pl.BlockSpec((TB, NC_PAD), lambda i: (i, 0)),
        compiler_params=pltpu.CompilerParams(
            dimension_semantics=("parallel",),
            vmem_limit_bytes=vmem_limit),
    )(vis_p, aud_p,
      pp["w1v"], pp["w1a"], pp["b1"],
      pp["w2"], pp["b2"],
      pp["w3"], pp["b3"])
    return out[:B, :NUM_CLASSES]


# ------------------------------------------------------------ references ----
def fusion_head_ref_f32(vis, aud, raw):
    """Exact PyTorch-eval-mode semantics, all f32 (unfolded BNs)."""
    def bn(x, g, b, m, v):
        return (x - m) / jnp.sqrt(v + BN_EPS) * g + b
    x = jnp.concatenate([vis, aud], axis=-1)
    x = bn(x, *raw["bn1"])
    h = x @ raw["w1"] + raw["b1"]
    h = jnp.maximum(bn(h, *raw["bn2"]), 0.0)
    h = h @ raw["w2"] + raw["b2"]
    h = jnp.maximum(bn(h, *raw["bn3"]), 0.0)
    return h @ raw["w3"] + raw["b3"]


def fusion_head_ref_prepped(vis, aud, pp):
    """Same numerics as the kernel (bf16 weights/dot inputs, f32 accum)."""
    h = jnp.dot(vis.astype(jnp.bfloat16), pp["w1v"],
                preferred_element_type=jnp.float32)
    h = h + jnp.dot(aud.astype(jnp.bfloat16), pp["w1a"],
                    preferred_element_type=jnp.float32)
    h = jnp.maximum(h + pp["b1"], 0.0)
    h = jnp.dot(h.astype(jnp.bfloat16), pp["w2"],
                preferred_element_type=jnp.float32)
    h = jnp.maximum(h + pp["b2"], 0.0)
    y = jnp.dot(h.astype(jnp.bfloat16), pp["w3"],
                preferred_element_type=jnp.float32) + pp["b3"]
    return y[:, :NUM_CLASSES]


# ----------------------------------------------------------------- main -----
if __name__ == "__main__":
    key = jax.random.PRNGKey(0)
    k_vis, k_aud, k_param = jax.random.split(key, 3)

    B = 2
    # Embeddings produced by the (external) visual / audio extractors.
    # The backbones' last op should emit bf16 so no extra cast pass is needed.
    vis_feat = jax.random.normal(k_vis, (B, VIS_DIM), jnp.float32).astype(jnp.bfloat16)
    aud_feat = jax.random.normal(k_aud, (B, AUD_DIM), jnp.float32).astype(jnp.bfloat16)

    raw = init_raw_params(k_param)
    pp = prep_params(raw)

    out = fusion_head(vis_feat, aud_feat, pp)
    out = jax.block_until_ready(out)

    assert out.shape == (B, NUM_CLASSES)
    assert bool(jnp.all(jnp.isfinite(out)))

    # tight check: kernel vs identical-precision JAX reference
    ref_pp = fusion_head_ref_prepped(vis_feat, aud_feat, pp)
    assert bool(jnp.allclose(out, ref_pp, atol=1e-3, rtol=1e-3))

    # loose check: kernel vs exact f32 unfolded-BN semantics on the same
    # (bf16-valued) embeddings -- bf16 weights / intermediates introduce
    # ~0.5-1% relative error, well inside this tolerance.
    ref_f32 = fusion_head_ref_f32(vis_feat.astype(jnp.float32),
                                  aud_feat.astype(jnp.float32), raw)
    assert bool(jnp.allclose(out, ref_f32, atol=3e-2, rtol=3e-2))

    print("KERNEL_OK")
</pallas_src>

<mosaic_0001>
module attributes {stable_mosaic.version = 11 : i64} {
  func.func @fusion_kernel(%arg0: i32, %arg1: memref<8x1280xbf16, #tpu.memory_space<vmem>>, %arg2: memref<8x128xbf16, #tpu.memory_space<vmem>>, %arg3: memref<1280x512xbf16, #tpu.memory_space<vmem>>, %arg4: memref<128x512xbf16, #tpu.memory_space<vmem>>, %arg5: memref<1x512xf32, #tpu.memory_space<vmem>>, %arg6: memref<512x512xbf16, #tpu.memory_space<vmem>>, %arg7: memref<1x512xf32, #tpu.memory_space<vmem>>, %arg8: memref<512x128xbf16, #tpu.memory_space<vmem>>, %arg9: memref<1x128xf32, #tpu.memory_space<vmem>>, %arg10: memref<8x128xf32, #tpu.memory_space<vmem>>) attributes {dimension_semantics = [#tpu.dimension_semantics<parallel>], iteration_bounds = array<i64: 1>, scalar_prefetch = 0 : i64, scratch_operands = 0 : i64, tpu.core_type = #tpu.core_type<tc>, window_params = [{transform_indices = @transform_0, window_bounds = array<i64: 8, 1280>}, {transform_indices = @transform_1, window_bounds = array<i64: 8, 128>}, {pipeline_mode = #tpu.pipeline_mode<synchronous>, transform_indices = @transform_2, window_bounds = array<i64: 1280, 512>}, {pipeline_mode = #tpu.pipeline_mode<synchronous>, transform_indices = @transform_3, window_bounds = array<i64: 128, 512>}, {pipeline_mode = #tpu.pipeline_mode<synchronous>, transform_indices = @transform_4, window_bounds = array<i64: 1, 512>}, {pipeline_mode = #tpu.pipeline_mode<synchronous>, transform_indices = @transform_5, window_bounds = array<i64: 512, 512>}, {pipeline_mode = #tpu.pipeline_mode<synchronous>, transform_indices = @transform_6, window_bounds = array<i64: 1, 512>}, {pipeline_mode = #tpu.pipeline_mode<synchronous>, transform_indices = @transform_7, window_bounds = array<i64: 512, 128>}, {pipeline_mode = #tpu.pipeline_mode<synchronous>, transform_indices = @transform_8, window_bounds = array<i64: 1, 128>}, {transform_indices = @transform_9, window_bounds = array<i64: 8, 128>}]} {
    %c0 = arith.constant 0 : index
    %c0_0 = arith.constant 0 : index
    %0 = vector.load %arg1[%c0, %c0_0] : memref<8x1280xbf16, #tpu.memory_space<vmem>>, vector<8x1280xbf16>
    %c0_1 = arith.constant 0 : index
    %c0_2 = arith.constant 0 : index
    %1 = vector.load %arg3[%c0_1, %c0_2] : memref<1280x512xbf16, #tpu.memory_space<vmem>>, vector<1280x512xbf16>
    %cst = arith.constant dense<0.000000e+00> : vector<8x512xf32>
    %2 = tpu.matmul %0, %1, %cst {dimension_numbers = #tpu.dot_dimension_numbers<[1], [0], [0], [1], [0, 0, 1, 1], [], []>} : vector<8x1280xbf16>, vector<1280x512xbf16>, vector<8x512xf32> -> vector<8x512xf32>
    %c0_3 = arith.constant 0 : index
    %c0_4 = arith.constant 0 : index
    %3 = vector.load %arg2[%c0_3, %c0_4] : memref<8x128xbf16, #tpu.memory_space<vmem>>, vector<8x128xbf16>
    %c0_5 = arith.constant 0 : index
    %c0_6 = arith.constant 0 : index
    %4 = vector.load %arg4[%c0_5, %c0_6] : memref<128x512xbf16, #tpu.memory_space<vmem>>, vector<128x512xbf16>
    %cst_7 = arith.constant dense<0.000000e+00> : vector<8x512xf32>
    %5 = tpu.matmul %3, %4, %cst_7 {dimension_numbers = #tpu.dot_dimension_numbers<[1], [0], [0], [1], [0, 0, 1, 1], [], []>} : vector<8x128xbf16>, vector<128x512xbf16>, vector<8x512xf32> -> vector<8x512xf32>
    %6 = arith.addf %2, %5 : vector<8x512xf32>
    %c0_8 = arith.constant 0 : index
    %c0_9 = arith.constant 0 : index
    %7 = vector.load %arg5[%c0_8, %c0_9] : memref<1x512xf32, #tpu.memory_space<vmem>>, vector<1x512xf32>
    %8 = vector.broadcast %7 : vector<1x512xf32> to vector<8x512xf32>
    %9 = arith.addf %6, %8 : vector<8x512xf32>
    %cst_10 = arith.constant 0.000000e+00 : f32
    %10 = vector.broadcast %cst_10 : f32 to vector<8x512xf32>
    %11 = arith.maximumf %9, %10 : vector<8x512xf32>
    %12 = arith.truncf %11 : vector<8x512xf32> to vector<8x512xbf16>
    %c0_11 = arith.constant 0 : index
    %c0_12 = arith.constant 0 : index
    %13 = vector.load %arg6[%c0_11, %c0_12] : memref<512x512xbf16, #tpu.memory_space<vmem>>, vector<512x512xbf16>
    %cst_13 = arith.constant dense<0.000000e+00> : vector<8x512xf32>
    %14 = tpu.matmul %12, %13, %cst_13 {dimension_numbers = #tpu.dot_dimension_numbers<[1], [0], [0], [1], [0, 0, 1, 1], [], []>} : vector<8x512xbf16>, vector<512x512xbf16>, vector<8x512xf32> -> vector<8x512xf32>
    %c0_14 = arith.constant 0 : index
    %c0_15 = arith.constant 0 : index
    %15 = vector.load %arg7[%c0_14, %c0_15] : memref<1x512xf32, #tpu.memory_space<vmem>>, vector<1x512xf32>
    %16 = vector.broadcast %15 : vector<1x512xf32> to vector<8x512xf32>
    %17 = arith.addf %14, %16 : vector<8x512xf32>
    %cst_16 = arith.constant 0.000000e+00 : f32
    %18 = vector.broadcast %cst_16 : f32 to vector<8x512xf32>
    %19 = arith.maximumf %17, %18 : vector<8x512xf32>
    %20 = arith.truncf %19 : vector<8x512xf32> to vector<8x512xbf16>
    %c0_17 = arith.constant 0 : index
    %c0_18 = arith.constant 0 : index
    %21 = vector.load %arg8[%c0_17, %c0_18] : memref<512x128xbf16, #tpu.memory_space<vmem>>, vector<512x128xbf16>
    %cst_19 = arith.constant dense<0.000000e+00> : vector<8x128xf32>
    %22 = tpu.matmul %20, %21, %cst_19 {dimension_numbers = #tpu.dot_dimension_numbers<[1], [0], [0], [1], [0, 0, 1, 1], [], []>} : vector<8x512xbf16>, vector<512x128xbf16>, vector<8x128xf32> -> vector<8x128xf32>
    %c0_20 = arith.constant 0 : index
    %c0_21 = arith.constant 0 : index
    %23 = vector.load %arg9[%c0_20, %c0_21] : memref<1x128xf32, #tpu.memory_space<vmem>>, vector<1x128xf32>
    %24 = vector.broadcast %23 : vector<1x128xf32> to vector<8x128xf32>
    %25 = arith.addf %22, %24 : vector<8x128xf32>
    %c0_22 = arith.constant 0 : index
    %c0_23 = arith.constant 0 : index
    %26 = vector.load %arg10[%c0_22, %c0_23] : memref<8x128xf32, #tpu.memory_space<vmem>>, vector<8x128xf32>
    tpu.vector_store %arg10[%c0_22, %c0_23], %25 {strides = array<i32>} : memref<8x128xf32, #tpu.memory_space<vmem>>, vector<8x128xf32>,
    return
  }
  func.func @transform_0(%arg0: i32) -> (i32, i32) {
    %c0_i32 = arith.constant 0 : i32
    %c0_i32_0 = arith.constant 0 : i32
    return %arg0, %c0_i32 : i32, i32
  }
  func.func @transform_1(%arg0: i32) -> (i32, i32) {
    %c0_i32 = arith.constant 0 : i32
    %c0_i32_0 = arith.constant 0 : i32
    return %arg0, %c0_i32 : i32, i32
  }
  func.func @transform_2(%arg0: i32) -> (i32, i32) {
    %c0_i32 = arith.constant 0 : i32
    %c0_i32_0 = arith.constant 0 : i32
    %c0_i32_1 = arith.constant 0 : i32
    return %c0_i32, %c0_i32_0 : i32, i32
  }
  func.func @transform_3(%arg0: i32) -> (i32, i32) {
    %c0_i32 = arith.constant 0 : i32
    %c0_i32_0 = arith.constant 0 : i32
    %c0_i32_1 = arith.constant 0 : i32
    return %c0_i32, %c0_i32_0 : i32, i32
  }
  func.func @transform_4(%arg0: i32) -> (i32, i32) {
    %c0_i32 = arith.constant 0 : i32
    %c0_i32_0 = arith.constant 0 : i32
    %c0_i32_1 = arith.constant 0 : i32
    return %c0_i32, %c0_i32_0 : i32, i32
  }
  func.func @transform_5(%arg0: i32) -> (i32, i32) {
    %c0_i32 = arith.constant 0 : i32
    %c0_i32_0 = arith.constant 0 : i32
    %c0_i32_1 = arith.constant 0 : i32
    return %c0_i32, %c0_i32_0 : i32, i32
  }
  func.func @transform_6(%arg0: i32) -> (i32, i32) {
    %c0_i32 = arith.constant 0 : i32
    %c0_i32_0 = arith.constant 0 : i32
    %c0_i32_1 = arith.constant 0 : i32
    return %c0_i32, %c0_i32_0 : i32, i32
  }
  func.func @transform_7(%arg0: i32) -> (i32, i32) {
    %c0_i32 = arith.constant 0 : i32
    %c0_i32_0 = arith.constant 0 : i32
    %c0_i32_1 = arith.constant 0 : i32
    return %c0_i32, %c0_i32_0 : i32, i32
  }
  func.func @transform_8(%arg0: i32) -> (i32, i32) {
    %c0_i32 = arith.constant 0 : i32
    %c0_i32_0 = arith.constant 0 : i32
    %c0_i32_1 = arith.constant 0 : i32
    return %c0_i32, %c0_i32_0 : i32, i32
  }
  func.func @transform_9(%arg0: i32) -> (i32, i32) {
    %c0_i32 = arith.constant 0 : i32
    %c0_i32_0 = arith.constant 0 : i32
    return %arg0, %c0_i32 : i32, i32
  }
}

</mosaic_0001>

<bundles_post_ra>
// kernel: tpu_custom_call.1
= control target key start
LH: loop header
LB: loop body
LE: loop exit
PB: predicated region body
PF: predicated region fallthrough
CT: control target
= control target key end

     0   :  { %14 = vsyncpa [#allocation3], 0  ;;  %s5949_s0 = inlined_call_operand.hbm [shape: bf16[8,1280], index: 0, kind: input, shape index: {}]   ;;  %s5950_s1 = inlined_call_operand.hbm [shape: bf16[8,128], index: 1, kind: input, shape index: {}]   ;;  %s5951_s2 = inlined_call_operand.hbm [shape: bf16[1280,512], index: 2, kind: input, shape index: {}]   ;;  %s5952_s3 = inlined_call_operand.hbm [shape: bf16[128,512], index: 3, kind: input, shape index: {}]   ;;  %s5953_s4 = inlined_call_operand.hbm [shape: f32[1,512], index: 4, kind: input, shape index: {}]   ;;  %s5954_s5 = inlined_call_operand.hbm [shape: bf16[512,512], index: 5, kind: input, shape index: {}]   ;;  %s5955_s6 = inlined_call_operand.hbm [shape: f32[1,512], index: 6, kind: input, shape index: {}]   ;;  %s5956_s7 = inlined_call_operand.hbm [shape: bf16[512,128], index: 7, kind: input, shape index: {}]   ;;  %s5957_s8 = inlined_call_operand.hbm [shape: f32[1,128], index: 8, kind: input, shape index: {}]   ;;  %s5958_s9 = inlined_call_operand.hbm [shape: f32[8,128], index: 9, kind: output, shape index: {}]  }
   0x1   :  { %15 = vsyncpa [#allocation6], 0 }
   0x2   :  { %16 = vsyncpa [#allocation9], 0 }
   0x3   :  { %17 = vsyncpa [#allocation12], 0 }
   0x4   :  { %18 = vsyncpa [#allocation15], 0 }
   0x5   :  { %19 = vsyncpa [#allocation4], 0  ;;  %s5706_s30 = smov [#allocation5]  }
   0x6   :  { %s36_s10 = sshll.u32 %s5706_s30, 4  ;;  %s37_s10 = int_to_ptr.vmem [resolvable:$true] %s36_s10 }
   0x7   :  { %s5502_s11 = scalar_lea.vmem %s37_s10, 64  ;;  %p5507_p1 = scmp.lt.s32.totalorder %s37_s10, %s37_s10 }
   0x8   :  { %p5503_p0 = scmp.ne.s32.totalorder %s37_s10, %s5502_s11  ;;  %p5508_p2 = scmp.lt.s32.totalorder %s5502_s11, %s5502_s11 }
   0xa   :  { %p5509_p3 = por %p5508_p2, %p5507_p1 }
   0xc   :  { %p5510_p4 = pnand %p5509_p3, %p5503_p0 }
   0xe   :  { %5513 = shalt.err (!%p5510_p4)
}
   0xf   :  { %39 = dma.hbm_to_vmem [thread:$0]  %s5950_s1, 64, %s37_s10, [#allocation6]  }
  0x10   :  { %s5707_s14 = smov [#allocation8]   ;;  %s5708_s16 = smov [#allocation11]  }
  0x11   :  { %s57_s15 = sshll.u32 %s5707_s14, 4  ;;  %s79_s17 = sshll.u32 %s5708_s16, 4  ;;  %s58_s15 = int_to_ptr.vmem [resolvable:$true] %s57_s15  ;;  %s80_s17 = int_to_ptr.vmem [resolvable:$true] %s79_s17 }
  0x12   :  { %s5522_s18 = scalar_lea.vmem %s58_s15, 4096  ;;  %p5527_p6 = scmp.lt.s32.totalorder %s58_s15, %s58_s15 }
  0x13   :  { %p5523_p5 = scmp.ne.s32.totalorder %s58_s15, %s5522_s18  ;;  %p5528_p7 = scmp.lt.s32.totalorder %s5522_s18, %s5522_s18 }
  0x15   :  { %p5529_p8 = por %p5528_p7, %p5527_p6 }
  0x17   :  { %p5530_p9 = pnand %p5529_p8, %p5523_p5 }
  0x19   :  { %5533 = shalt.err (!%p5530_p9)
}
  0x1a   :  { %s5709_s19 = smov 256   ;;  %s5710_s20 = smov 16  }
  0x1b   :  { %63 = dma.hbm_to_vmem [thread:$0]  %s5952_s3, 4096, %s58_s15, [#allocation9], %s5709_s19, %s5709_s19, %s5710_s20  }
  0x1c   :  { %s5542_s1 = scalar_lea.vmem %s80_s17, 16384  ;;  %p5547_p11 = scmp.lt.s32.totalorder %s80_s17, %s80_s17 }
  0x1d   :  { %p5543_p10 = scmp.ne.s32.totalorder %s80_s17, %s5542_s1  ;;  %p5548_p12 = scmp.lt.s32.totalorder %s5542_s1, %s5542_s1 }
  0x1f   :  { %p5549_p13 = por %p5548_p12, %p5547_p11 }
  0x21   :  { %p5550_p0 = pnand %p5549_p13, %p5543_p10 }
  0x23   :  { %5553 = shalt.err (!%p5550_p0)
}
  0x24   :  { %85 = dma.hbm_to_vmem [thread:$0]  %s5954_s5, 16384, %s80_s17, [#allocation12], %s5709_s19, %s5709_s19, %s5710_s20  }
  0x25   :  { %s5711_s25 = smov [#allocation14]  }
  0x26   :  { %s101_s26 = sshll.u32 %s5711_s25, 4  ;;  %s102_s26 = int_to_ptr.vmem [resolvable:$true] %s101_s26 }
  0x27   :  { %s5562_s27 = scalar_lea.vmem %s102_s26, 4096  ;;  %p5567_p2 = scmp.lt.s32.totalorder %s102_s26, %s102_s26 }
  0x28   :  { %p5563_p1 = scmp.ne.s32.totalorder %s102_s26, %s5562_s27  ;;  %p5568_p3 = scmp.lt.s32.totalorder %s5562_s27, %s5562_s27 }
  0x2a   :  { %p5569_p4 = por %p5568_p3, %p5567_p2 }
  0x2c   :  { %p5570_p5 = pnand %p5569_p4, %p5563_p1 }
  0x2e   :  { %5573 = shalt.err (!%p5570_p5)
}
  0x2f   :  { %s5712_s3 = smov 64   ;;  %s5713_s28 = smov 4  }
  0x30   :  { %107 = dma.hbm_to_vmem [thread:$0]  %s5956_s7, 4096, %s102_s26, [#allocation15], %s5712_s3, %s5712_s3, %s5713_s28  }
  0x31   :  { %s5714_s10 = smov [#allocation2]   ;;  %s5715_s12 = smov [#allocation7]  }
  0x32   :  { %s26_s11 = sshll.u32 %s5714_s10, 4  ;;  %s45_s5 = sshll.u32 %s5715_s12, 4  ;;  %s27_s11 = int_to_ptr.vmem [resolvable:$true] %s26_s11  ;;  %s46_s5 = int_to_ptr.vmem [resolvable:$true] %s45_s5 }
  0x33   :  { %s5582_s13 = scalar_lea.vmem %s27_s11, 640  ;;  %p5587_p7 = scmp.lt.s32.totalorder %s27_s11, %s27_s11 }
  0x34   :  { %p5583_p6 = scmp.ne.s32.totalorder %s27_s11, %s5582_s13  ;;  %p5588_p8 = scmp.lt.s32.totalorder %s5582_s13, %s5582_s13 }
  0x36   :  { %p5589_p9 = por %p5588_p8, %p5587_p7 }
  0x38   :  { %p5590_p10 = pnand %p5589_p9, %p5583_p6 }
  0x3a   :  { %5593 = shalt.err (!%p5590_p10)
}
  0x3b   :  { %29 = dma.hbm_to_vmem [thread:$0]  %s5949_s0, 640, %s27_s11, [#allocation3]  }
  0x3c   :  { %s5602_s16 = scalar_lea.vmem %s46_s5, 40960  ;;  %p5607_p12 = scmp.lt.s32.totalorder %s46_s5, %s46_s5 }
  0x3d   :  { %p5603_p11 = scmp.ne.s32.totalorder %s46_s5, %s5602_s16  ;;  %p5608_p13 = scmp.lt.s32.totalorder %s5602_s16, %s5602_s16 }
  0x3f   :  { %p5609_p0 = por %p5608_p13, %p5607_p12 }
  0x41   :  { %p5610_p1 = pnand %p5609_p0, %p5603_p11 }
  0x43   :  { %5613 = shalt.err (!%p5610_p1)
}
  0x44   :  { %51 = dma.hbm_to_vmem [thread:$0]  %s5951_s2, 40960, %s46_s5, [#allocation6], %s5709_s19, %s5709_s19, %s5710_s20  }
  0x45   :  { %s5716_s18 = smov [#allocation10]   ;;  %s5717_s22 = smov [#allocation13]  }
  0x46   :  { %s70_s21 = sshll.u32 %s5716_s18, 4  ;;  %s92_s1 = sshll.u32 %s5717_s22, 4  ;;  %s71_s21 = int_to_ptr.vmem [resolvable:$true] %s70_s21  ;;  %s93_s1 = int_to_ptr.vmem [resolvable:$true] %s92_s1 }
  0x47   :  { %s5622_s0 = scalar_lea.vmem %s71_s21, 64  ;;  %p5627_p3 = scmp.lt.s32.totalorder %s71_s21, %s71_s21 }
  0x48   :  { %p5623_p2 = scmp.ne.s32.totalorder %s71_s21, %s5622_s0  ;;  %p5628_p4 = scmp.lt.s32.totalorder %s5622_s0, %s5622_s0 }
  0x4a   :  { %p5629_p5 = por %p5628_p4, %p5627_p3 }
  0x4c   :  { %p5630_p6 = pnand %p5629_p5, %p5623_p2 }
  0x4e   :  { %5633 = shalt.err (!%p5630_p6)
}
  0x4f   :  { %73 = dma.hbm_to_vmem [thread:$0]  %s5953_s4, 64, %s71_s21, [#allocation9]  }
  0x50   :  { %s5642_s25 = scalar_lea.vmem %s93_s1, 64  ;;  %p5647_p8 = scmp.lt.s32.totalorder %s93_s1, %s93_s1 }
  0x51   :  { %p5643_p7 = scmp.ne.s32.totalorder %s93_s1, %s5642_s25  ;;  %p5648_p9 = scmp.lt.s32.totalorder %s5642_s25, %s5642_s25 }
  0x53   :  { %p5649_p10 = por %p5648_p9, %p5647_p8 }
  0x55   :  { %p5650_p11 = pnand %p5649_p10, %p5643_p7 }
  0x57   :  { %5653 = shalt.err (!%p5650_p11)
}
  0x58   :  { %95 = dma.hbm_to_vmem [thread:$0]  %s5955_s6, 64, %s93_s1, [#allocation12]  }
  0x59   :  { %s5718_s20 = smov [#allocation16]  }
  0x5a   :  { %s114_s26 = sshll.u32 %s5718_s20, 4  ;;  %s115_s26 = int_to_ptr.vmem [resolvable:$true] %s114_s26 }
  0x5b   :  { %s5662_s27 = scalar_lea.vmem %s115_s26, 16  ;;  %s5666_s3 = scalar_lea.vmem %s115_s26, 32 }
  0x5c   :  { %p5663_p12 = scmp.ne.s32.totalorder %s115_s26, %s5662_s27  ;;  %p5667_p13 = scmp.lt.s32.totalorder %s115_s26, %s115_s26 }
  0x5d   :  { %p5668_p0 = scmp.lt.s32.totalorder %s5666_s3, %s5662_s27 }
  0x5f   :  { %p5669_p1 = por %p5668_p0, %p5667_p13 }
  0x61   :  { %p5670_p2 = pnand %p5669_p1, %p5663_p12 }
  0x63   :  { %5673 = shalt.err (!%p5670_p2)
}
  0x64   :  { %117 = dma.hbm_to_vmem [thread:$0]  %s5957_s8, 16, %s115_s26, [#allocation15]  }
  0x65   :  { %5694 = dma.done.wait [#allocation3], 640  }
  0x66   :  { %5695 = vsyncadd [#allocation3], 4294966656 }
  0x67   :  { %5696 = dma.done.wait [#allocation6], 41024  }
  0x68   :  { %5697 = vsyncadd [#allocation6], 4294926272 }
  0x69   :  { %5698 = dma.done.wait [#allocation9], 4160  }
  0x6a   :  { %5699 = vsyncadd [#allocation9], 4294963136 }
  0x6b   :  { %5700 = dma.done.wait [#allocation12], 16448  }
  0x6c   :  { %5701 = vsyncadd [#allocation12], 4294950848 }
  0x6d   :  { %5702 = dma.done.wait [#allocation15], 4112  }
  0x6e   :  { %5703 = vsyncadd [#allocation15], 4294963184  ;;  %v5719_v0 = vmov 0   ;;  %v4732_v1 = vld [vmem:[#allocation8 + $0xe4] ss:$16 sps:$4 sm:$0xff]   ;;  %s5720_s6 = smov [#allocation17]  }
  0x6f   :  { %696 = vmatprep.mubr.bf16.mxu0 %v5719_v0  ;;  %737 = vmatprep.mubr.bf16.mxu1 %v5719_v0  ;;  %v4734_v2 = vld [vmem:[#allocation8 + $0xec] ss:$16 sps:$4 sm:$0xff]   ;;  %v4736_v3 = vld [vmem:[#allocation8 + $0xe0] ss:$16 sps:$4 sm:$0xff]   ;;  %v4737_v4 = vld [vmem:[#allocation8 + $0xe8] ss:$16 sps:$4 sm:$0xff]  }
  0x70   :  { %664 = vmatprep.subr.bf16.mxu0 %v4732_v1  ;;  %705 = vmatprep.subr.bf16.mxu1 %v4734_v2  ;;  %v4738_v5 = vld [vmem:[#allocation8 + $0xc4] ss:$16 sps:$4 sm:$0xff]   ;;  %v4740_v6 = vld [vmem:[#allocation8 + $0xcc] ss:$16 sps:$4 sm:$0xff]   ;;  %v4742_v7 = vld [vmem:[#allocation8 + $0xc0] ss:$16 sps:$4 sm:$0xff]  }
  0x71   :  { %665 = vmatpush1.bf16.msra.mxu0 %v4736_v3  ;;  %706 = vmatpush1.bf16.msra.mxu1 %v4737_v4  ;;  %v4743_v8 = vld [vmem:[#allocation8 + $0xc8] ss:$16 sps:$4 sm:$0xff]   ;;  %v4744_v9 = vld [vmem:[#allocation8 + $0xa4] ss:$16 sps:$4 sm:$0xff]   ;;  %v4746_v10 = vld [vmem:[#allocation8 + $0xac] ss:$16 sps:$4 sm:$0xff]  }
  0x72   :  { %666 = vmatprep.subr.bf16.mxu0 %v4738_v5  ;;  %707 = vmatprep.subr.bf16.mxu1 %v4740_v6  ;;  %v4748_v11 = vld [vmem:[#allocation8 + $0xa0] ss:$16 sps:$4 sm:$0xff]   ;;  %v4749_v12 = vld [vmem:[#allocation8 + $0xa8] ss:$16 sps:$4 sm:$0xff]   ;;  %v4750_v13 = vld [vmem:[#allocation8 + $0x84] ss:$16 sps:$4 sm:$0xff]  }
  0x73   :  { %v4752_v14 = vld [vmem:[#allocation8 + $0x8c] ss:$16 sps:$4 sm:$0xff]   ;;  %v4754_v15 = vld [vmem:[#allocation8 + $0x80] ss:$16 sps:$4 sm:$0xff]   ;;  %v4755_v16 = vld [vmem:[#allocation8 + $0x88] ss:$16 sps:$4 sm:$0xff]  }
  0x74   :  { %v4756_v17 = vld [vmem:[#allocation8 + $0x64] ss:$16 sps:$4 sm:$0xff]   ;;  %v4758_v18 = vld [vmem:[#allocation8 + $0x6c] ss:$16 sps:$4 sm:$0xff]   ;;  %v4760_v19 = vld [vmem:[#allocation8 + $0x60] ss:$16 sps:$4 sm:$0xff]  }
  0x75   :  { %667 = vmatpush1.bf16.msra.mxu0 %v4742_v7  ;;  %708 = vmatpush1.bf16.msra.mxu1 %v4743_v8  ;;  %v4761_v20 = vld [vmem:[#allocation8 + $0x68] ss:$16 sps:$4 sm:$0xff]   ;;  %v4762_v21 = vld [vmem:[#allocation8 + $0x44] ss:$16 sps:$4 sm:$0xff]   ;;  %v4764_v22 = vld [vmem:[#allocation8 + $0x4c] ss:$16 sps:$4 sm:$0xff]  }
  0x76   :  { %668 = vmatprep.subr.bf16.mxu0 %v4744_v9  ;;  %709 = vmatprep.subr.bf16.mxu1 %v4746_v10  ;;  %v4766_v23 = vld [vmem:[#allocation8 + $0x40] ss:$16 sps:$4 sm:$0xff]   ;;  %v4767_v24 = vld [vmem:[#allocation8 + $0x48] ss:$16 sps:$4 sm:$0xff]   ;;  %v4768_v25 = vld [vmem:[#allocation8 + $0x24] ss:$16 sps:$4 sm:$0xff]  }
  0x77   :  { %v4770_v26 = vld [vmem:[#allocation8 + $0x2c] ss:$16 sps:$4 sm:$0xff]   ;;  %v4772_v27 = vld [vmem:[#allocation8 + $0x20] ss:$16 sps:$4 sm:$0xff]   ;;  %v4773_v28 = vld [vmem:[#allocation8 + $0x28] ss:$16 sps:$4 sm:$0xff]  }
  0x78   :  { %v4774_v29 = vld [vmem:[#allocation8 + $0x4] ss:$16 sps:$4 sm:$0xff]   ;;  %v4776_v30 = vld [vmem:[#allocation8 + $0xc] ss:$16 sps:$4 sm:$0xff]   ;;  %v4778_v31 = vld [vmem:[#allocation8] ss:$16 sps:$4 sm:$0xff]  }
  0x79   :  { %669 = vmatpush1.bf16.msra.mxu0 %v4748_v11  ;;  %710 = vmatpush1.bf16.msra.mxu1 %v4749_v12  ;;  %v4779_v32 = vld [vmem:[#allocation8 + $0x8] ss:$16 sps:$4 sm:$0xff]   ;;  %v4782_v33 = vld [vmem:[#allocation7 + $0xe4] ss:$16 sps:$4 sm:$0xff]   ;;  %v471_v35 = vld [vmem:[#allocation5] sm:$0xf] }
  0x7a   :  { %670 = vmatprep.subr.bf16.mxu0 %v4750_v13  ;;  %711 = vmatprep.subr.bf16.mxu1 %v4752_v14  ;;  %v4785_v34 = vld [vmem:[#allocation7 + $0x2e4] ss:$16 sps:$4 sm:$0xff]   ;;  %v4780_v36 = vld [vmem:[#allocation7 + $0xe0] ss:$16 sps:$4 sm:$0xff]   ;;  %s4137_s8 = sshll.u32 %s5720_s6, 4  ;;  %s4138_s8 = int_to_ptr.vmem [resolvable:$true] %s4137_s8 }
  0x7b   :  { %v4783_v37 = vld [vmem:[#allocation7 + $0x2e0] ss:$16 sps:$4 sm:$0xff]   ;;  %v4788_v38 = vld [vmem:[#allocation7 + $0xc4] ss:$16 sps:$4 sm:$0xff]   ;;  %s5674_s29 = scalar_lea.vmem %s4138_s8, 128  ;;  %p5679_p4 = scmp.lt.s32.totalorder %s4138_s8, %s4138_s8 }
  0x7c   :  { %v4791_v39 = vld [vmem:[#allocation7 + $0x2c4] ss:$16 sps:$4 sm:$0xff]   ;;  %v4786_v40 = vld [vmem:[#allocation7 + $0xc0] ss:$16 sps:$4 sm:$0xff]   ;;  %p5675_p3 = scmp.ne.s32.totalorder %s4138_s8, %s5674_s29  ;;  %p5680_p5 = scmp.lt.s32.totalorder %s5674_s29, %s5674_s29 }
  0x7d   :  { %671 = vmatpush1.bf16.msra.mxu0 %v4754_v15  ;;  %712 = vmatpush1.bf16.msra.mxu1 %v4755_v16  ;;  %v4789_v41 = vld [vmem:[#allocation7 + $0x2c0] ss:$16 sps:$4 sm:$0xff]   ;;  %v4794_v42 = vld [vmem:[#allocation7 + $0xa4] ss:$16 sps:$4 sm:$0xff]  }
  0x7e   :  { %672 = vmatprep.subr.bf16.mxu0 %v4756_v17  ;;  %713 = vmatprep.subr.bf16.mxu1 %v4758_v18  ;;  %v4797_v43 = vld [vmem:[#allocation7 + $0x2a4] ss:$16 sps:$4 sm:$0xff]   ;;  %v4792_v44 = vld [vmem:[#allocation7 + $0xa0] ss:$16 sps:$4 sm:$0xff]   ;;  %p5681_p6 = por %p5680_p5, %p5679_p4 }
  0x7f   :  { %v4795_v45 = vld [vmem:[#allocation7 + $0x2a0] ss:$16 sps:$4 sm:$0xff]   ;;  %v4800_v46 = vld [vmem:[#allocation7 + $0x84] ss:$16 sps:$4 sm:$0xff]  }
  0x80   :  { %v4803_v47 = vld [vmem:[#allocation7 + $0x284] ss:$16 sps:$4 sm:$0xff]   ;;  %v4798_v48 = vld [vmem:[#allocation7 + $0x80] ss:$16 sps:$4 sm:$0xff]   ;;  %p5682_p7 = pnand %p5681_p6, %p5675_p3 }
  0x81   :  { %673 = vmatpush1.bf16.msra.mxu0 %v4760_v19  ;;  %714 = vmatpush1.bf16.msra.mxu1 %v4761_v20  ;;  %v4801_v49 = vld [vmem:[#allocation7 + $0x280] ss:$16 sps:$4 sm:$0xff]   ;;  %v4806_v50 = vld [vmem:[#allocation7 + $0x64] ss:$16 sps:$4 sm:$0xff]  }
  0x82   :  { %674 = vmatprep.subr.bf16.mxu0 %v4762_v21  ;;  %715 = vmatprep.subr.bf16.mxu1 %v4764_v22  ;;  %v4809_v51 = vld [vmem:[#allocation7 + $0x264] ss:$16 sps:$4 sm:$0xff]   ;;  %v4804_v52 = vld [vmem:[#allocation7 + $0x60] ss:$16 sps:$4 sm:$0xff]  }
  0x83   :  { %v4807_v53 = vld [vmem:[#allocation7 + $0x260] ss:$16 sps:$4 sm:$0xff]   ;;  %v4812_v54 = vld [vmem:[#allocation7 + $0x44] ss:$16 sps:$4 sm:$0xff]  }
  0x84   :  { %v4815_v55 = vld [vmem:[#allocation7 + $0x244] ss:$16 sps:$4 sm:$0xff]   ;;  %v4810_v56 = vld [vmem:[#allocation7 + $0x40] ss:$16 sps:$4 sm:$0xff]  }
  0x85   :  { %675 = vmatpush1.bf16.msra.mxu0 %v4766_v23  ;;  %716 = vmatpush1.bf16.msra.mxu1 %v4767_v24  ;;  %v4813_v57 = vld [vmem:[#allocation7 + $0x240] ss:$16 sps:$4 sm:$0xff]   ;;  %v4818_v58 = vld [vmem:[#allocation7 + $0x24] ss:$16 sps:$4 sm:$0xff]  }
  0x86   :  { %676 = vmatprep.subr.bf16.mxu0 %v4768_v25  ;;  %717 = vmatprep.subr.bf16.mxu1 %v4770_v26  ;;  %v4821_v59 = vld [vmem:[#allocation7 + $0x224] ss:$16 sps:$4 sm:$0xff]   ;;  %v4816_v60 = vld [vmem:[#allocation7 + $0x20] ss:$16 sps:$4 sm:$0xff]  }
  0x87   :  { %v4819_v61 = vld [vmem:[#allocation7 + $0x220] ss:$16 sps:$4 sm:$0xff]   ;;  %v4824_v62 = vld [vmem:[#allocation7 + $0x4] ss:$16 sps:$4 sm:$0xff]  }
  0x88   :  { %v4827_v63 = vld [vmem:[#allocation7 + $0x204] ss:$16 sps:$4 sm:$0xff]   ;;  %v4822_v0 = vld [vmem:[#allocation7] ss:$16 sps:$4 sm:$0xff]  }
  0x89   :  { %677 = vmatpush1.bf16.msra.mxu0 %v4772_v27  ;;  %718 = vmatpush1.bf16.msra.mxu1 %v4773_v28  ;;  %v4825_v1 = vld [vmem:[#allocation7 + $0x200] ss:$16 sps:$4 sm:$0xff]   ;;  %v4830_v2 = vld [vmem:[#allocation7 + $0x1e4] ss:$16 sps:$4 sm:$0xff]  }
  0x8a   :  { %678 = vmatprep.subr.bf16.mxu0 %v4774_v29  ;;  %719 = vmatprep.subr.bf16.mxu1 %v4776_v30  ;;  %v4833_v3 = vld [vmem:[#allocation7 + $0x3e4] ss:$16 sps:$4 sm:$0xff]   ;;  %v4828_v4 = vld [vmem:[#allocation7 + $0x1e0] ss:$16 sps:$4 sm:$0xff]  }
  0x8b   :  { %v4831_v5 = vld [vmem:[#allocation7 + $0x3e0] ss:$16 sps:$4 sm:$0xff]   ;;  %v4836_v6 = vld [vmem:[#allocation7 + $0x1c4] ss:$16 sps:$4 sm:$0xff]  }
  0x8c   :  { %v5807_v7 = vld [vmem:[#allocation2] sm:$0xff]  ;;  %v5809_v8 = vld [vmem:[#allocation2 + $0x8] sm:$0xff] }
  0x8d   :  { %679 = vmatpush1.bf16.msra.mxu0 %v4778_v31  ;;  %720 = vmatpush1.bf16.msra.mxu1 %v4779_v32  ;;  %v4839_v9 = vld [vmem:[#allocation7 + $0x3c4] ss:$16 sps:$4 sm:$0xff]   ;;  %v5813_v10 = vcombine.high %v5807_v7, %v5807_v7  ;;  %v5817_v11 = vcombine.high %v5809_v8, %v5809_v8  ;;  %v4834_v12 = vld [vmem:[#allocation7 + $0x1c0] ss:$16 sps:$4 sm:$0xff]  }
  0x8e   :  { %2381 = vmatprep.subr.bf16.mxu0 %v4782_v33  ;;  %2422 = vmatprep.subr.bf16.mxu1 %v4785_v34  ;;  %v4837_v13 = vld [vmem:[#allocation7 + $0x3c0] ss:$16 sps:$4 sm:$0xff]   ;;  %v4842_v14 = vld [vmem:[#allocation7 + $0x1a4] ss:$16 sps:$4 sm:$0xff]  }
  0x8f   :  { %v4845_v15 = vld [vmem:[#allocation7 + $0x3a4] ss:$16 sps:$4 sm:$0xff]   ;;  %v4840_v16 = vld [vmem:[#allocation7 + $0x1a0] ss:$16 sps:$4 sm:$0xff]  }
  0x90   :  { %697 = vmatmul.mubr.bf16.vlgmr.msra.gmra.mxu0 %v471_v35  ;;  %738 = vmatmul.mubr.bf16.vlgmr.msra.gmra.mxu1 %v471_v35  ;;  %v4843_v17 = vld [vmem:[#allocation7 + $0x3a0] ss:$16 sps:$4 sm:$0xff]   ;;  %v4848_v18 = vld [vmem:[#allocation7 + $0x184] ss:$16 sps:$4 sm:$0xff]  }
  0x91   :  { %2382 = vmatpush1.bf16.msra.mxu0 %v4780_v36  ;;  %2423 = vmatpush1.bf16.msra.mxu1 %v4783_v37  ;;  %v4851_v19 = vld [vmem:[#allocation7 + $0x384] ss:$16 sps:$4 sm:$0xff]   ;;  %v4846_v20 = vld [vmem:[#allocation7 + $0x180] ss:$16 sps:$4 sm:$0xff]  }
  0x92   :  { %2383 = vmatprep.subr.bf16.mxu0 %v4788_v38  ;;  %2424 = vmatprep.subr.bf16.mxu1 %v4791_v39  ;;  %v4849_v21 = vld [vmem:[#allocation7 + $0x380] ss:$16 sps:$4 sm:$0xff]   ;;  %v4854_v22 = vld [vmem:[#allocation7 + $0x164] ss:$16 sps:$4 sm:$0xff]  }
  0x93   :  { %2413 = vmatprep.mubr.bf16.mxu0 %v5813_v10  ;;  %2454 = vmatprep.mubr.bf16.mxu1 %v5817_v11  ;;  %v4857_v23 = vld [vmem:[#allocation7 + $0x364] ss:$16 sps:$4 sm:$0xff]   ;;  %v4852_v24 = vld [vmem:[#allocation7 + $0x160] ss:$16 sps:$4 sm:$0xff]  }
  0x94   :  { %v4855_v25 = vld [vmem:[#allocation7 + $0x360] ss:$16 sps:$4 sm:$0xff]   ;;  %v4860_v26 = vld [vmem:[#allocation7 + $0x144] ss:$16 sps:$4 sm:$0xff]  }
  0x95   :  { %2384 = vmatpush1.bf16.msra.mxu0 %v4786_v40  ;;  %2425 = vmatpush1.bf16.msra.mxu1 %v4789_v41  ;;  %v4863_v27 = vld [vmem:[#allocation7 + $0x344] ss:$16 sps:$4 sm:$0xff]   ;;  %v4858_v28 = vld [vmem:[#allocation7 + $0x140] ss:$16 sps:$4 sm:$0xff]   ;;  %v5823_v40 = vcombine.low %v5807_v7, %v5807_v7  ;;  %v5827_v41 = vcombine.low %v5809_v8, %v5809_v8 }
  0x96   :  { %2385 = vmatprep.subr.bf16.mxu0 %v4794_v42  ;;  %2426 = vmatprep.subr.bf16.mxu1 %v4797_v43  ;;  %v4861_v29 = vld [vmem:[#allocation7 + $0x340] ss:$16 sps:$4 sm:$0xff]   ;;  %v4866_v30 = vld [vmem:[#allocation7 + $0x124] ss:$16 sps:$4 sm:$0xff]  }
  0x97   :  { %v4869_v31 = vld [vmem:[#allocation7 + $0x324] ss:$16 sps:$4 sm:$0xff]   ;;  %v4864_v32 = vld [vmem:[#allocation7 + $0x120] ss:$16 sps:$4 sm:$0xff]  }
  0x98   :  { %v4867_v33 = vld [vmem:[#allocation7 + $0x320] ss:$16 sps:$4 sm:$0xff]   ;;  %v4872_v34 = vld [vmem:[#allocation7 + $0x104] ss:$16 sps:$4 sm:$0xff]  }
  0x99   :  { %2386 = vmatpush1.bf16.msra.mxu0 %v4792_v44  ;;  %2427 = vmatpush1.bf16.msra.mxu1 %v4795_v45  ;;  %v4875_v35 = vld [vmem:[#allocation7 + $0x304] ss:$16 sps:$4 sm:$0xff]   ;;  %v4870_v36 = vld [vmem:[#allocation7 + $0x100] ss:$16 sps:$4 sm:$0xff]  }
  0x9a   :  { %2387 = vmatprep.subr.bf16.mxu0 %v4800_v46  ;;  %2428 = vmatprep.subr.bf16.mxu1 %v4803_v47  ;;  %v4873_v37 = vld [vmem:[#allocation7 + $0x300] ss:$16 sps:$4 sm:$0xff]   ;;  %v4882_v38 = vld [vmem:[#allocation7 + $0x4e4] ss:$16 sps:$4 sm:$0xff]  }
  0x9b   :  { %v4885_v39 = vld [vmem:[#allocation7 + $0x6e4] ss:$16 sps:$4 sm:$0xff]   ;;  %v4880_v42 = vld [vmem:[#allocation7 + $0x4e0] ss:$16 sps:$4 sm:$0xff]  }
  0x9c   :  { %v4883_v43 = vld [vmem:[#allocation7 + $0x6e0] ss:$16 sps:$4 sm:$0xff]   ;;  %v4888_v44 = vld [vmem:[#allocation7 + $0x4c4] ss:$16 sps:$4 sm:$0xff]  }
  0x9d   :  { %2388 = vmatpush1.bf16.msra.mxu0 %v4798_v48  ;;  %2429 = vmatpush1.bf16.msra.mxu1 %v4801_v49  ;;  %v4891_v45 = vld [vmem:[#allocation7 + $0x6c4] ss:$16 sps:$4 sm:$0xff]   ;;  %v4886_v46 = vld [vmem:[#allocation7 + $0x4c0] ss:$16 sps:$4 sm:$0xff]  }
  0x9e   :  { %2389 = vmatprep.subr.bf16.mxu0 %v4806_v50  ;;  %2430 = vmatprep.subr.bf16.mxu1 %v4809_v51  ;;  %v4889_v47 = vld [vmem:[#allocation7 + $0x6c0] ss:$16 sps:$4 sm:$0xff]   ;;  %v4894_v48 = vld [vmem:[#allocation7 + $0x4a4] ss:$16 sps:$4 sm:$0xff]  }
  0x9f   :  { %v4897_v49 = vld [vmem:[#allocation7 + $0x6a4] ss:$16 sps:$4 sm:$0xff]   ;;  %v4892_v50 = vld [vmem:[#allocation7 + $0x4a0] ss:$16 sps:$4 sm:$0xff]  }
  0xa0   :  { %v4895_v51 = vld [vmem:[#allocation7 + $0x6a0] ss:$16 sps:$4 sm:$0xff]   ;;  %v4924_v8 = vld [vmem:[#allocation7 + $0x404] ss:$16 sps:$4 sm:$0xff]  }
  0xa1   :  { %2390 = vmatpush1.bf16.msra.mxu0 %v4804_v52  ;;  %2431 = vmatpush1.bf16.msra.mxu1 %v4807_v53  ;;  %v4900_v52 = vld [vmem:[#allocation7 + $0x484] ss:$16 sps:$4 sm:$0xff]   ;;  %v4919_v7 = vld [vmem:[#allocation7 + $0x620] ss:$16 sps:$4 sm:$0xff]  }
  0xa2   :  { %2391 = vmatprep.subr.bf16.mxu0 %v4812_v54  ;;  %2432 = vmatprep.subr.bf16.mxu1 %v4815_v55  ;;  %v4903_v53 = vld [vmem:[#allocation7 + $0x684] ss:$16 sps:$4 sm:$0xff]   ;;  %v4898_v54 = vld [vmem:[#allocation7 + $0x480] ss:$16 sps:$4 sm:$0xff]  }
  0xa3   :  { %v4901_v55 = vld [vmem:[#allocation7 + $0x680] ss:$16 sps:$4 sm:$0xff]  }
  0xa5   :  { %2392 = vmatpush1.bf16.msra.mxu0 %v4810_v56  ;;  %2433 = vmatpush1.bf16.msra.mxu1 %v4813_v57  ;;  %v5831_v56 = vld [vmem:[#allocation2 + $0x10] sm:$0xff] }
  0xa6   :  { %2393 = vmatprep.subr.bf16.mxu0 %v4818_v58  ;;  %2434 = vmatprep.subr.bf16.mxu1 %v4821_v59  ;;  %v5835_v57 = vcombine.high %v5831_v56, %v5831_v56  ;;  %v5837_v58 = vld [vmem:[#allocation2 + $0x18] sm:$0xff]  ;;  %v4906_v59 = vld [vmem:[#allocation7 + $0x464] ss:$16 sps:$4 sm:$0xff]  }
  0xa9   :  { %2394 = vmatpush1.bf16.msra.mxu0 %v4816_v60  ;;  %2435 = vmatpush1.bf16.msra.mxu1 %v4819_v61  ;;  %v4909_v60 = vld [vmem:[#allocation7 + $0x664] ss:$16 sps:$4 sm:$0xff]   ;;  %v5841_v61 = vcombine.high %v5837_v58, %v5837_v58 }
  0xaa   :  { %2395 = vmatprep.subr.bf16.mxu0 %v4824_v62  ;;  %2436 = vmatprep.subr.bf16.mxu1 %v4827_v63  ;;  %v4904_v62 = vld [vmem:[#allocation7 + $0x460] ss:$16 sps:$4 sm:$0xff]  }
  0xab   :  { %v4907_v63 = vld [vmem:[#allocation7 + $0x660] ss:$16 sps:$4 sm:$0xff]  }
  0xad   :  { %2396 = vmatpush1.bf16.msra.mxu0 %v4822_v0  ;;  %2437 = vmatpush1.bf16.msra.mxu1 %v4825_v1  ;;  %v4912_v0 = vld [vmem:[#allocation7 + $0x444] ss:$16 sps:$4 sm:$0xff]  }
  0xae   :  { %2397 = vmatprep.subr.bf16.mxu0 %v4830_v2  ;;  %2438 = vmatprep.subr.bf16.mxu1 %v4833_v3  ;;  %v4915_v1 = vld [vmem:[#allocation7 + $0x644] ss:$16 sps:$4 sm:$0xff]   ;;  %v4910_v2 = vld [vmem:[#allocation7 + $0x440] ss:$16 sps:$4 sm:$0xff]  }
  0xaf   :  { %v4913_v3 = vld [vmem:[#allocation7 + $0x640] ss:$16 sps:$4 sm:$0xff]  }
  0xb1   :  { %2398 = vmatpush2.bf16.msra.mxu0 %v4828_v4  ;;  %2439 = vmatpush2.bf16.msra.mxu1 %v4831_v5  ;;  %v4918_v4 = vld [vmem:[#allocation7 + $0x424] ss:$16 sps:$4 sm:$0xff]  }
  0xb2   :  { %2399 = vmatprep.subr.bf16.mxu0 %v4836_v6  ;;  %2440 = vmatprep.subr.bf16.mxu1 %v4839_v9  ;;  %v4921_v5 = vld [vmem:[#allocation7 + $0x624] ss:$16 sps:$4 sm:$0xff]   ;;  %v4916_v6 = vld [vmem:[#allocation7 + $0x420] ss:$16 sps:$4 sm:$0xff]  }
  0xb3   :  { %v4927_v9 = vld [vmem:[#allocation7 + $0x604] ss:$16 sps:$4 sm:$0xff]  }
  0xb5   :  { %2400 = vmatpush2.bf16.msra.mxu0 %v4834_v12  ;;  %2441 = vmatpush2.bf16.msra.mxu1 %v4837_v13  ;;  %v4922_v12 = vld [vmem:[#allocation7 + $0x400] ss:$16 sps:$4 sm:$0xff]  }
  0xb6   :  { %2401 = vmatprep.subr.bf16.mxu0 %v4842_v14  ;;  %2442 = vmatprep.subr.bf16.mxu1 %v4845_v15  ;;  %v4925_v13 = vld [vmem:[#allocation7 + $0x600] ss:$16 sps:$4 sm:$0xff]   ;;  %v4930_v14 = vld [vmem:[#allocation7 + $0x5e4] ss:$16 sps:$4 sm:$0xff]  }
  0xb7   :  { %v4933_v15 = vld [vmem:[#allocation7 + $0x7e4] ss:$16 sps:$4 sm:$0xff]  }
  0xb9   :  { %2402 = vmatpush2.bf16.msra.mxu0 %v4840_v16  ;;  %2443 = vmatpush2.bf16.msra.mxu1 %v4843_v17  ;;  %v4928_v16 = vld [vmem:[#allocation7 + $0x5e0] ss:$16 sps:$4 sm:$0xff]  }
  0xba   :  { %2403 = vmatprep.subr.bf16.mxu0 %v4848_v18  ;;  %2444 = vmatprep.subr.bf16.mxu1 %v4851_v19  ;;  %v4931_v17 = vld [vmem:[#allocation7 + $0x7e0] ss:$16 sps:$4 sm:$0xff]   ;;  %v4936_v18 = vld [vmem:[#allocation7 + $0x5c4] ss:$16 sps:$4 sm:$0xff]  }
  0xbb   :  { %v4939_v19 = vld [vmem:[#allocation7 + $0x7c4] ss:$16 sps:$4 sm:$0xff]  }
  0xbd   :  { %2404 = vmatpush2.bf16.msra.mxu0 %v4846_v20  ;;  %2445 = vmatpush2.bf16.msra.mxu1 %v4849_v21  ;;  %v4934_v20 = vld [vmem:[#allocation7 + $0x5c0] ss:$16 sps:$4 sm:$0xff]  }
  0xbe   :  { %2405 = vmatprep.subr.bf16.mxu0 %v4854_v22  ;;  %2446 = vmatprep.subr.bf16.mxu1 %v4857_v23  ;;  %v4937_v21 = vld [vmem:[#allocation7 + $0x7c0] ss:$16 sps:$4 sm:$0xff]   ;;  %v4942_v22 = vld [vmem:[#allocation7 + $0x5a4] ss:$16 sps:$4 sm:$0xff]  }
  0xbf   :  { %v4945_v23 = vld [vmem:[#allocation7 + $0x7a4] ss:$16 sps:$4 sm:$0xff]  }
  0xc1   :  { %2406 = vmatpush2.bf16.msra.mxu0 %v4852_v24  ;;  %2447 = vmatpush2.bf16.msra.mxu1 %v4855_v25  ;;  %v4940_v24 = vld [vmem:[#allocation7 + $0x5a0] ss:$16 sps:$4 sm:$0xff]  }
  0xc2   :  { %2407 = vmatprep.subr.bf16.mxu0 %v4860_v26  ;;  %2448 = vmatprep.subr.bf16.mxu1 %v4863_v27  ;;  %v4943_v25 = vld [vmem:[#allocation7 + $0x7a0] ss:$16 sps:$4 sm:$0xff]   ;;  %v4948_v26 = vld [vmem:[#allocation7 + $0x584] ss:$16 sps:$4 sm:$0xff]  }
  0xc3   :  { %v4951_v27 = vld [vmem:[#allocation7 + $0x784] ss:$16 sps:$4 sm:$0xff]  }
  0xc5   :  { %2408 = vmatpush2.bf16.msra.mxu0 %v4858_v28  ;;  %2449 = vmatpush2.bf16.msra.mxu1 %v4861_v29  ;;  %v4946_v28 = vld [vmem:[#allocation7 + $0x580] ss:$16 sps:$4 sm:$0xff]  }
  0xc6   :  { %2409 = vmatprep.subr.bf16.mxu0 %v4866_v30  ;;  %2450 = vmatprep.subr.bf16.mxu1 %v4869_v31  ;;  %v4949_v29 = vld [vmem:[#allocation7 + $0x780] ss:$16 sps:$4 sm:$0xff]   ;;  %v4954_v30 = vld [vmem:[#allocation7 + $0x564] ss:$16 sps:$4 sm:$0xff]  }
  0xc7   :  { %v4957_v31 = vld [vmem:[#allocation7 + $0x764] ss:$16 sps:$4 sm:$0xff]  }
  0xc9   :  { %2410 = vmatpush2.bf16.msra.mxu0 %v4864_v32  ;;  %2451 = vmatpush2.bf16.msra.mxu1 %v4867_v33  ;;  %v4952_v32 = vld [vmem:[#allocation7 + $0x560] ss:$16 sps:$4 sm:$0xff]  }
  0xca   :  { %2411 = vmatprep.subr.bf16.mxu0 %v4872_v34  ;;  %2452 = vmatprep.subr.bf16.mxu1 %v4875_v35  ;;  %v4955_v33 = vld [vmem:[#allocation7 + $0x760] ss:$16 sps:$4 sm:$0xff]   ;;  %v4960_v34 = vld [vmem:[#allocation7 + $0x544] ss:$16 sps:$4 sm:$0xff]  }
  0xcb   :  { %v4963_v35 = vld [vmem:[#allocation7 + $0x744] ss:$16 sps:$4 sm:$0xff]  }
  0xcd   :  { %2412 = vmatpush2.bf16.msra.mxu0 %v4870_v36  ;;  %2453 = vmatpush2.bf16.msra.mxu1 %v4873_v37  ;;  %v4958_v36 = vld [vmem:[#allocation7 + $0x540] ss:$16 sps:$4 sm:$0xff]  }
  0xce   :  { %2463 = vmatprep.subr.bf16.mxu0 %v4882_v38  ;;  %2504 = vmatprep.subr.bf16.mxu1 %v4885_v39  ;;  %v4961_v37 = vld [vmem:[#allocation7 + $0x740] ss:$16 sps:$4 sm:$0xff]   ;;  %v4966_v38 = vld [vmem:[#allocation7 + $0x524] ss:$16 sps:$4 sm:$0xff]  }
  0xcf   :  { %v4969_v39 = vld [vmem:[#allocation7 + $0x724] ss:$16 sps:$4 sm:$0xff]  }
  0xd0   :  { %2414 = vmatmul.mubr.bf16.vlgmr.msra.gmra.mxu0 %v5823_v40  ;;  %2455 = vmatmul.mubr.bf16.vlgmr.msra.gmra.mxu1 %v5827_v41 }
  0xd1   :  { %2464 = vmatpush1.bf16.msra.mxu0 %v4880_v42  ;;  %2505 = vmatpush1.bf16.msra.mxu1 %v4883_v43  ;;  %v4964_v42 = vld [vmem:[#allocation7 + $0x520] ss:$16 sps:$4 sm:$0xff]  }
  0xd2   :  { %2465 = vmatprep.subr.bf16.mxu0 %v4888_v44  ;;  %2506 = vmatprep.subr.bf16.mxu1 %v4891_v45  ;;  %v4967_v43 = vld [vmem:[#allocation7 + $0x720] ss:$16 sps:$4 sm:$0xff]   ;;  %v4972_v44 = vld [vmem:[#allocation7 + $0x504] ss:$16 sps:$4 sm:$0xff]  }
  0xd3   :  { %2495 = vmatprep.mubr.bf16.mxu0 %v5835_v57  ;;  %2536 = vmatprep.mubr.bf16.mxu1 %v5841_v61  ;;  %v4975_v45 = vld [vmem:[#allocation7 + $0x704] ss:$16 sps:$4 sm:$0xff]  }
  0xd5   :  { %2466 = vmatpush1.bf16.msra.mxu0 %v4886_v46  ;;  %2507 = vmatpush1.bf16.msra.mxu1 %v4889_v47  ;;  %v4970_v46 = vld [vmem:[#allocation7 + $0x500] ss:$16 sps:$4 sm:$0xff]  }
  0xd6   :  { %2467 = vmatprep.subr.bf16.mxu0 %v4894_v48  ;;  %2508 = vmatprep.subr.bf16.mxu1 %v4897_v49  ;;  %v4973_v47 = vld [vmem:[#allocation7 + $0x700] ss:$16 sps:$4 sm:$0xff]   ;;  %v4982_v48 = vld [vmem:[#allocation7 + $0x8e4] ss:$16 sps:$4 sm:$0xff]   ;;  %v4985_v49 = vld [vmem:[#allocation7 + $0xec] ss:$16 sps:$4 sm:$0xff]  }
  0xd9   :  { %2468 = vmatpush1.bf16.msra.mxu0 %v4892_v50  ;;  %2509 = vmatpush1.bf16.msra.mxu1 %v4895_v51  ;;  %v5847_v50 = vcombine.low %v5831_v56, %v5831_v56  ;;  %v5851_v51 = vcombine.low %v5837_v58, %v5837_v58  ;;  %v4986_v56 = vld [vmem:[#allocation7 + $0x8c0] ss:$16 sps:$4 sm:$0xff]   ;;  %v4989_v58 = vld [vmem:[#allocation7 + $0xc8] ss:$16 sps:$4 sm:$0xff]  }
  0xda   :  { %2469 = vmatprep.subr.bf16.mxu0 %v4900_v52  ;;  %2510 = vmatprep.subr.bf16.mxu1 %v4903_v53  ;;  %v5853_v52 = vld [vmem:[#allocation2 + $0x20] sm:$0xff]  ;;  %v4980_v53 = vld [vmem:[#allocation7 + $0x8e0] ss:$16 sps:$4 sm:$0xff]  }
  0xdd   :  { %2470 = vmatpush1.bf16.msra.mxu0 %v4898_v54  ;;  %2511 = vmatpush1.bf16.msra.mxu1 %v4901_v55  ;;  %v4983_v54 = vld [vmem:[#allocation7 + $0xe8] ss:$16 sps:$4 sm:$0xff]   ;;  %v4988_v55 = vld [vmem:[#allocation7 + $0x8c4] ss:$16 sps:$4 sm:$0xff]  }
  0xde   :  { %2471 = vmatprep.subr.bf16.mxu0 %v4906_v59  ;;  %2512 = vmatprep.subr.bf16.mxu1 %v4909_v60  ;;  %v4991_v59 = vld [vmem:[#allocation7 + $0xcc] ss:$16 sps:$4 sm:$0xff]   ;;  %v5857_v60 = vcombine.high %v5853_v52, %v5853_v52 }
  0xe1   :  { %2472 = vmatpush1.bf16.msra.mxu0 %v4904_v62  ;;  %2513 = vmatpush1.bf16.msra.mxu1 %v4907_v63  ;;  %v4994_v62 = vld [vmem:[#allocation7 + $0x8a4] ss:$16 sps:$4 sm:$0xff]   ;;  %v4997_v63 = vld [vmem:[#allocation7 + $0xac] ss:$16 sps:$4 sm:$0xff]  }
  0xe2   :  { %2473 = vmatprep.subr.bf16.mxu0 %v4912_v0  ;;  %2514 = vmatprep.subr.bf16.mxu1 %v4915_v1  ;;  %v4992_v0 = vld [vmem:[#allocation7 + $0x8a0] ss:$16 sps:$4 sm:$0xff]   ;;  %v4995_v1 = vld [vmem:[#allocation7 + $0xa8] ss:$16 sps:$4 sm:$0xff]  }
  0xe5   :  { %2474 = vmatpush1.bf16.msra.mxu0 %v4910_v2  ;;  %2515 = vmatpush1.bf16.msra.mxu1 %v4913_v3  ;;  %v5000_v2 = vld [vmem:[#allocation7 + $0x884] ss:$16 sps:$4 sm:$0xff]   ;;  %v5003_v3 = vld [vmem:[#allocation7 + $0x8c] ss:$16 sps:$4 sm:$0xff]  }
  0xe6   :  { %2475 = vmatprep.subr.bf16.mxu0 %v4918_v4  ;;  %2516 = vmatprep.subr.bf16.mxu1 %v4921_v5  ;;  %v4998_v4 = vld [vmem:[#allocation7 + $0x880] ss:$16 sps:$4 sm:$0xff]   ;;  %v5001_v5 = vld [vmem:[#allocation7 + $0x88] ss:$16 sps:$4 sm:$0xff]  }
  0xe9   :  { %2476 = vmatpush1.bf16.msra.mxu0 %v4916_v6  ;;  %2517 = vmatpush1.bf16.msra.mxu1 %v4919_v7  ;;  %v5006_v6 = vld [vmem:[#allocation7 + $0x864] ss:$16 sps:$4 sm:$0xff]   ;;  %v5009_v7 = vld [vmem:[#allocation7 + $0x6c] ss:$16 sps:$4 sm:$0xff]  }
  0xea   :  { %2477 = vmatprep.subr.bf16.mxu0 %v4924_v8  ;;  %2518 = vmatprep.subr.bf16.mxu1 %v4927_v9  ;;  %v5004_v8 = vld [vmem:[#allocation7 + $0x860] ss:$16 sps:$4 sm:$0xff]   ;;  %v5012_v9 = vld [vmem:[#allocation7 + $0x844] ss:$16 sps:$4 sm:$0xff]  }
  0xed   :  { %2478 = vmatpush1.bf16.msra.mxu0 %v4922_v12  ;;  %2519 = vmatpush1.bf16.msra.mxu1 %v4925_v13  ;;  %v5015_v12 = vld [vmem:[#allocation7 + $0x4c] ss:$16 sps:$4 sm:$0xff]   ;;  %v5010_v13 = vld [vmem:[#allocation7 + $0x840] ss:$16 sps:$4 sm:$0xff]  }
  0xee   :  { %2479 = vmatprep.subr.bf16.mxu0 %v4930_v14  ;;  %2520 = vmatprep.subr.bf16.mxu1 %v4933_v15  ;;  %v5013_v14 = vld [vmem:[#allocation7 + $0x48] ss:$16 sps:$4 sm:$0xff]   ;;  %v5018_v15 = vld [vmem:[#allocation7 + $0x824] ss:$16 sps:$4 sm:$0xff]  }
  0xf1   :  { %2480 = vmatpush2.bf16.msra.mxu0 %v4928_v16  ;;  %2521 = vmatpush2.bf16.msra.mxu1 %v4931_v17  ;;  %v5021_v16 = vld [vmem:[#allocation7 + $0x2c] ss:$16 sps:$4 sm:$0xff]   ;;  %v5016_v17 = vld [vmem:[#allocation7 + $0x820] ss:$16 sps:$4 sm:$0xff]  }
  0xf2   :  { %2481 = vmatprep.subr.bf16.mxu0 %v4936_v18  ;;  %2522 = vmatprep.subr.bf16.mxu1 %v4939_v19  ;;  %v5019_v18 = vld [vmem:[#allocation7 + $0x28] ss:$16 sps:$4 sm:$0xff]   ;;  %v5024_v19 = vld [vmem:[#allocation7 + $0x804] ss:$16 sps:$4 sm:$0xff]  }
  0xf5   :  { %2482 = vmatpush2.bf16.msra.mxu0 %v4934_v20  ;;  %2523 = vmatpush2.bf16.msra.mxu1 %v4937_v21  ;;  %v5027_v20 = vld [vmem:[#allocation7 + $0xc] ss:$16 sps:$4 sm:$0xff]   ;;  %v5022_v21 = vld [vmem:[#allocation7 + $0x800] ss:$16 sps:$4 sm:$0xff]  }
  0xf6   :  { %2483 = vmatprep.subr.bf16.mxu0 %v4942_v22  ;;  %2524 = vmatprep.subr.bf16.mxu1 %v4945_v23  ;;  %v5025_v22 = vld [vmem:[#allocation7 + $0x8] ss:$16 sps:$4 sm:$0xff]   ;;  %v5030_v23 = vld [vmem:[#allocation7 + $0x9e4] ss:$16 sps:$4 sm:$0xff]  }
  0xf9   :  { %2484 = vmatpush2.bf16.msra.mxu0 %v4940_v24  ;;  %2525 = vmatpush2.bf16.msra.mxu1 %v4943_v25  ;;  %v5033_v24 = vld [vmem:[#allocation7 + $0x1ec] ss:$16 sps:$4 sm:$0xff]   ;;  %v5028_v25 = vld [vmem:[#allocation7 + $0x9e0] ss:$16 sps:$4 sm:$0xff]  }
  0xfa   :  { %2485 = vmatprep.subr.bf16.mxu0 %v4948_v26  ;;  %2526 = vmatprep.subr.bf16.mxu1 %v4951_v27  ;;  %v5031_v26 = vld [vmem:[#allocation7 + $0x1e8] ss:$16 sps:$4 sm:$0xff]   ;;  %v5036_v27 = vld [vmem:[#allocation7 + $0x9c4] ss:$16 sps:$4 sm:$0xff]  }
  0xfd   :  { %2486 = vmatpush2.bf16.msra.mxu0 %v4946_v28  ;;  %2527 = vmatpush2.bf16.msra.mxu1 %v4949_v29  ;;  %v5039_v28 = vld [vmem:[#allocation7 + $0x1cc] ss:$16 sps:$4 sm:$0xff]   ;;  %v5034_v29 = vld [vmem:[#allocation7 + $0x9c0] ss:$16 sps:$4 sm:$0xff]  }
  0xfe   :  { %2487 = vmatprep.subr.bf16.mxu0 %v4954_v30  ;;  %2528 = vmatprep.subr.bf16.mxu1 %v4957_v31  ;;  %v5037_v30 = vld [vmem:[#allocation7 + $0x1c8] ss:$16 sps:$4 sm:$0xff]   ;;  %v5042_v31 = vld [vmem:[#allocation7 + $0x9a4] ss:$16 sps:$4 sm:$0xff]  }
 0x101   :  { %2488 = vmatpush2.bf16.msra.mxu0 %v4952_v32  ;;  %2529 = vmatpush2.bf16.msra.mxu1 %v4955_v33  ;;  %v5045_v32 = vld [vmem:[#allocation7 + $0x1ac] ss:$16 sps:$4 sm:$0xff]   ;;  %v5040_v33 = vld [vmem:[#allocation7 + $0x9a0] ss:$16 sps:$4 sm:$0xff]  }
 0x102   :  { %2489 = vmatprep.subr.bf16.mxu0 %v4960_v34  ;;  %2530 = vmatprep.subr.bf16.mxu1 %v4963_v35  ;;  %v5043_v34 = vld [vmem:[#allocation7 + $0x1a8] ss:$16 sps:$4 sm:$0xff]   ;;  %v5048_v35 = vld [vmem:[#allocation7 + $0x984] ss:$16 sps:$4 sm:$0xff]  }
 0x105   :  { %2490 = vmatpush2.bf16.msra.mxu0 %v4958_v36  ;;  %2531 = vmatpush2.bf16.msra.mxu1 %v4961_v37  ;;  %v5051_v36 = vld [vmem:[#allocation7 + $0x18c] ss:$16 sps:$4 sm:$0xff]   ;;  %v5046_v37 = vld [vmem:[#allocation7 + $0x980] ss:$16 sps:$4 sm:$0xff]  }
 0x106   :  { %2491 = vmatprep.subr.bf16.mxu0 %v4966_v38  ;;  %2532 = vmatprep.subr.bf16.mxu1 %v4969_v39  ;;  %v5049_v38 = vld [vmem:[#allocation7 + $0x188] ss:$16 sps:$4 sm:$0xff]   ;;  %v5054_v39 = vld [vmem:[#allocation7 + $0x964] ss:$16 sps:$4 sm:$0xff]  }
 0x109   :  { %2492 = vmatpush2.bf16.msra.mxu0 %v4964_v42  ;;  %2533 = vmatpush2.bf16.msra.mxu1 %v4967_v43  ;;  %v5057_v42 = vld [vmem:[#allocation7 + $0x16c] ss:$16 sps:$4 sm:$0xff]   ;;  %v5052_v43 = vld [vmem:[#allocation7 + $0x960] ss:$16 sps:$4 sm:$0xff]  }
 0x10a   :  { %2493 = vmatprep.subr.bf16.mxu0 %v4972_v44  ;;  %2534 = vmatprep.subr.bf16.mxu1 %v4975_v45  ;;  %v5055_v44 = vld [vmem:[#allocation7 + $0x168] ss:$16 sps:$4 sm:$0xff]   ;;  %v5060_v45 = vld [vmem:[#allocation7 + $0x944] ss:$16 sps:$4 sm:$0xff]  }
 0x10d   :  { %2494 = vmatpush2.bf16.msra.mxu0 %v4970_v46  ;;  %2535 = vmatpush2.bf16.msra.mxu1 %v4973_v47  ;;  %v5063_v46 = vld [vmem:[#allocation7 + $0x14c] ss:$16 sps:$4 sm:$0xff]   ;;  %v5058_v47 = vld [vmem:[#allocation7 + $0x940] ss:$16 sps:$4 sm:$0xff]  }
 0x10e   :  { %2545 = vmatprep.subr.bf16.mxu0 %v4982_v48  ;;  %2586 = vmatprep.subr.bf16.mxu1 %v4985_v49  ;;  %v5061_v48 = vld [vmem:[#allocation7 + $0x148] ss:$16 sps:$4 sm:$0xff]   ;;  %v5066_v49 = vld [vmem:[#allocation7 + $0x924] ss:$16 sps:$4 sm:$0xff]  }
 0x110   :  { %2496 = vmatmul.mubr.bf16.vlgmr.msra.gmra.mxu0 %v5847_v50  ;;  %2537 = vmatmul.mubr.bf16.vlgmr.msra.gmra.mxu1 %v5851_v51 }
 0x111   :  { %2546 = vmatpush1.bf16.msra.mxu0 %v4980_v53  ;;  %2587 = vmatpush1.bf16.msra.mxu1 %v4983_v54  ;;  %v5069_v53 = vld [vmem:[#allocation7 + $0x12c] ss:$16 sps:$4 sm:$0xff]   ;;  %v5064_v54 = vld [vmem:[#allocation7 + $0x920] ss:$16 sps:$4 sm:$0xff]  }
 0x112   :  { %2547 = vmatprep.subr.bf16.mxu0 %v4988_v55  ;;  %2588 = vmatprep.subr.bf16.mxu1 %v4991_v59  ;;  %v5067_v55 = vld [vmem:[#allocation7 + $0x128] ss:$16 sps:$4 sm:$0xff]   ;;  %v5072_v59 = vld [vmem:[#allocation7 + $0x904] ss:$16 sps:$4 sm:$0xff]  }
 0x113   :  { %2577 = vmatprep.mubr.bf16.mxu0 %v5857_v60  ;;  %2618 = vmatprep.mubr.bf16.mxu1 %v5813_v10  ;;  %v5007_v10 = vld [vmem:[#allocation7 + $0x68] ss:$16 sps:$4 sm:$0xff]  }
 0x115   :  { %2548 = vmatpush1.bf16.msra.mxu0 %v4986_v56  ;;  %2589 = vmatpush1.bf16.msra.mxu1 %v4989_v58  ;;  %v5075_v56 = vld [vmem:[#allocation7 + $0x10c] ss:$16 sps:$4 sm:$0xff]   ;;  %v5070_v58 = vld [vmem:[#allocation7 + $0x900] ss:$16 sps:$4 sm:$0xff]  }
 0x116   :  { %2549 = vmatprep.subr.bf16.mxu0 %v4994_v62  ;;  %2590 = vmatprep.subr.bf16.mxu1 %v4997_v63  ;;  %v5073_v62 = vld [vmem:[#allocation7 + $0x108] ss:$16 sps:$4 sm:$0xff]   ;;  %v5080_v63 = vld [vmem:[#allocation7 + $0x2ec] ss:$16 sps:$4 sm:$0xff]  }
 0x119   :  { %2550 = vmatpush1.bf16.msra.mxu0 %v4992_v0  ;;  %2591 = vmatpush1.bf16.msra.mxu1 %v4995_v1  ;;  %v5083_v0 = vld [vmem:[#allocation7 + $0x4ec] ss:$16 sps:$4 sm:$0xff]   ;;  %v5865_v1 = vcombine.low %v5853_v52, %v5853_v52  ;;  %v5084_v52 = vld [vmem:[#allocation7 + $0x2c8] ss:$16 sps:$4 sm:$0xff]  }
 0x11a   :  { %2551 = vmatprep.subr.bf16.mxu0 %v5000_v2  ;;  %2592 = vmatprep.subr.bf16.mxu1 %v5003_v3  ;;  %v5078_v2 = vld [vmem:[#allocation7 + $0x2e8] ss:$16 sps:$4 sm:$0xff]  }
 0x11b   :  { %v5081_v3 = vld [vmem:[#allocation7 + $0x4e8] ss:$16 sps:$4 sm:$0xff]  }
 0x11d   :  { %2552 = vmatpush1.bf16.msra.mxu0 %v4998_v4  ;;  %2593 = vmatpush1.bf16.msra.mxu1 %v5001_v5  ;;  %v5086_v4 = vld [vmem:[#allocation7 + $0x2cc] ss:$16 sps:$4 sm:$0xff]  }
 0x11e   :  { %2553 = vmatprep.subr.bf16.mxu0 %v5006_v6  ;;  %2594 = vmatprep.subr.bf16.mxu1 %v5009_v7  ;;  %v5089_v5 = vld [vmem:[#allocation7 + $0x4cc] ss:$16 sps:$4 sm:$0xff]  }
 0x121   :  { %2554 = vmatpush1.bf16.msra.mxu0 %v5004_v8  ;;  %2595 = vmatpush1.bf16.msra.mxu1 %v5007_v10  ;;  %v5087_v8 = vld [vmem:[#allocation7 + $0x4c8] ss:$16 sps:$4 sm:$0xff]  }
 0x122   :  { %2555 = vmatprep.subr.bf16.mxu0 %v5012_v9  ;;  %2596 = vmatprep.subr.bf16.mxu1 %v5015_v12  ;;  %v5092_v12 = vld [vmem:[#allocation7 + $0x2ac] ss:$16 sps:$4 sm:$0xff]  }
 0x125   :  { %2556 = vmatpush1.bf16.msra.mxu0 %v5010_v13  ;;  %2597 = vmatpush1.bf16.msra.mxu1 %v5013_v14  ;;  %v5095_v13 = vld [vmem:[#allocation7 + $0x4ac] ss:$16 sps:$4 sm:$0xff]  }
 0x126   :  { %2557 = vmatprep.subr.bf16.mxu0 %v5018_v15  ;;  %2598 = vmatprep.subr.bf16.mxu1 %v5021_v16  ;;  %v5093_v16 = vld [vmem:[#allocation7 + $0x4a8] ss:$16 sps:$4 sm:$0xff]  }
 0x129   :  { %2558 = vmatpush1.bf16.msra.mxu0 %v5016_v17  ;;  %2599 = vmatpush1.bf16.msra.mxu1 %v5019_v18 }
 0x12a   :  { %2559 = vmatprep.subr.bf16.mxu0 %v5024_v19  ;;  %2600 = vmatprep.subr.bf16.mxu1 %v5027_v20  ;;  %v5098_v19 = vld [vmem:[#allocation7 + $0x28c] ss:$16 sps:$4 sm:$0xff]  }
 0x12b   :  { %v5101_v20 = vld [vmem:[#allocation7 + $0x48c] ss:$16 sps:$4 sm:$0xff]  }
 0x12d   :  { %2560 = vmatpush1.bf16.msra.mxu0 %v5022_v21  ;;  %2601 = vmatpush1.bf16.msra.mxu1 %v5025_v22  ;;  %v5096_v21 = vld [vmem:[#allocation7 + $0x288] ss:$16 sps:$4 sm:$0xff]  }
 0x12e   :  { %2561 = vmatprep.subr.bf16.mxu0 %v5030_v23  ;;  %2602 = vmatprep.subr.bf16.mxu1 %v5033_v24  ;;  %v5099_v22 = vld [vmem:[#allocation7 + $0x488] ss:$16 sps:$4 sm:$0xff]  }
 0x12f   :  { %v5102_v23 = vld [vmem:[#allocation7 + $0x268] ss:$16 sps:$4 sm:$0xff]  }
 0x130   :  { %v5105_v24 = vld [vmem:[#allocation7 + $0x468] ss:$16 sps:$4 sm:$0xff]  }
 0x131   :  { %2562 = vmatpush2.bf16.msra.mxu0 %v5028_v25  ;;  %2603 = vmatpush2.bf16.msra.mxu1 %v5031_v26  ;;  %v5110_v25 = vld [vmem:[#allocation7 + $0x24c] ss:$16 sps:$4 sm:$0xff]  }
 0x132   :  { %2563 = vmatprep.subr.bf16.mxu0 %v5036_v27  ;;  %2604 = vmatprep.subr.bf16.mxu1 %v5039_v28  ;;  %v5113_v26 = vld [vmem:[#allocation7 + $0x44c] ss:$16 sps:$4 sm:$0xff]   ;;  %v5108_v27 = vld [vmem:[#allocation7 + $0x248] ss:$16 sps:$4 sm:$0xff]  }
 0x133   :  { %v5111_v28 = vld [vmem:[#allocation7 + $0x448] ss:$16 sps:$4 sm:$0xff]  }
 0x135   :  { %2564 = vmatpush2.bf16.msra.mxu0 %v5034_v29  ;;  %2605 = vmatpush2.bf16.msra.mxu1 %v5037_v30  ;;  %v5116_v29 = vld [vmem:[#allocation7 + $0x22c] ss:$16 sps:$4 sm:$0xff]  }
 0x136   :  { %2565 = vmatprep.subr.bf16.mxu0 %v5042_v31  ;;  %2606 = vmatprep.subr.bf16.mxu1 %v5045_v32  ;;  %v5119_v30 = vld [vmem:[#allocation7 + $0x42c] ss:$16 sps:$4 sm:$0xff]   ;;  %v5114_v31 = vld [vmem:[#allocation7 + $0x228] ss:$16 sps:$4 sm:$0xff]  }
 0x137   :  { %v5117_v32 = vld [vmem:[#allocation7 + $0x428] ss:$16 sps:$4 sm:$0xff]  }
 0x139   :  { %2566 = vmatpush2.bf16.msra.mxu0 %v5040_v33  ;;  %2607 = vmatpush2.bf16.msra.mxu1 %v5043_v34  ;;  %v5122_v33 = vld [vmem:[#allocation7 + $0x20c] ss:$16 sps:$4 sm:$0xff]  }
 0x13a   :  { %2567 = vmatprep.subr.bf16.mxu0 %v5048_v35  ;;  %2608 = vmatprep.subr.bf16.mxu1 %v5051_v36  ;;  %v5125_v34 = vld [vmem:[#allocation7 + $0x40c] ss:$16 sps:$4 sm:$0xff]   ;;  %v5120_v35 = vld [vmem:[#allocation7 + $0x208] ss:$16 sps:$4 sm:$0xff]  }
 0x13b   :  { %v5123_v36 = vld [vmem:[#allocation7 + $0x408] ss:$16 sps:$4 sm:$0xff]  }
 0x13d   :  { %2568 = vmatpush2.bf16.msra.mxu0 %v5046_v37  ;;  %2609 = vmatpush2.bf16.msra.mxu1 %v5049_v38  ;;  %v5128_v37 = vld [vmem:[#allocation7 + $0x3ec] ss:$16 sps:$4 sm:$0xff]  }
 0x13e   :  { %2569 = vmatprep.subr.bf16.mxu0 %v5054_v39  ;;  %2610 = vmatprep.subr.bf16.mxu1 %v5057_v42  ;;  %v5131_v38 = vld [vmem:[#allocation7 + $0x5ec] ss:$16 sps:$4 sm:$0xff]   ;;  %v5126_v39 = vld [vmem:[#allocation7 + $0x3e8] ss:$16 sps:$4 sm:$0xff]  }
 0x13f   :  { %v5129_v42 = vld [vmem:[#allocation7 + $0x5e8] ss:$16 sps:$4 sm:$0xff]  }
 0x141   :  { %2570 = vmatpush2.bf16.msra.mxu0 %v5052_v43  ;;  %2611 = vmatpush2.bf16.msra.mxu1 %v5055_v44  ;;  %v5134_v43 = vld [vmem:[#allocation7 + $0x3cc] ss:$16 sps:$4 sm:$0xff]  }
 0x142   :  { %2571 = vmatprep.subr.bf16.mxu0 %v5060_v45  ;;  %2612 = vmatprep.subr.bf16.mxu1 %v5063_v46  ;;  %v5137_v44 = vld [vmem:[#allocation7 + $0x5cc] ss:$16 sps:$4 sm:$0xff]   ;;  %v5132_v45 = vld [vmem:[#allocation7 + $0x3c8] ss:$16 sps:$4 sm:$0xff]  }
 0x143   :  { %v5135_v46 = vld [vmem:[#allocation7 + $0x5c8] ss:$16 sps:$4 sm:$0xff]  }
 0x145   :  { %2572 = vmatpush2.bf16.msra.mxu0 %v5058_v47  ;;  %2613 = vmatpush2.bf16.msra.mxu1 %v5061_v48  ;;  %v5140_v47 = vld [vmem:[#allocation7 + $0x3ac] ss:$16 sps:$4 sm:$0xff]  }
 0x146   :  { %2573 = vmatprep.subr.bf16.mxu0 %v5066_v49  ;;  %2614 = vmatprep.subr.bf16.mxu1 %v5069_v53  ;;  %v5143_v48 = vld [vmem:[#allocation7 + $0x5ac] ss:$16 sps:$4 sm:$0xff]   ;;  %v5138_v49 = vld [vmem:[#allocation7 + $0x3a8] ss:$16 sps:$4 sm:$0xff]  }
 0x147   :  { %v5141_v53 = vld [vmem:[#allocation7 + $0x5a8] ss:$16 sps:$4 sm:$0xff]  }
 0x149   :  { %2574 = vmatpush2.bf16.msra.mxu0 %v5064_v54  ;;  %2615 = vmatpush2.bf16.msra.mxu1 %v5067_v55  ;;  %v5146_v54 = vld [vmem:[#allocation7 + $0x38c] ss:$16 sps:$4 sm:$0xff]  }
 0x14a   :  { %2575 = vmatprep.subr.bf16.mxu0 %v5072_v59  ;;  %2616 = vmatprep.subr.bf16.mxu1 %v5075_v56  ;;  %v5149_v55 = vld [vmem:[#allocation7 + $0x58c] ss:$16 sps:$4 sm:$0xff]   ;;  %v5144_v59 = vld [vmem:[#allocation7 + $0x388] ss:$16 sps:$4 sm:$0xff]  }
 0x14b   :  { %v5147_v56 = vld [vmem:[#allocation7 + $0x588] ss:$16 sps:$4 sm:$0xff]  }
 0x14d   :  { %2576 = vmatpush2.bf16.msra.mxu0 %v5070_v58  ;;  %2617 = vmatpush2.bf16.msra.mxu1 %v5073_v62  ;;  %v5152_v58 = vld [vmem:[#allocation7 + $0x36c] ss:$16 sps:$4 sm:$0xff]  }
 0x14e   :  { %2627 = vmatprep.subr.bf16.mxu0 %v5080_v63  ;;  %2668 = vmatprep.subr.bf16.mxu1 %v5083_v0  ;;  %v5155_v62 = vld [vmem:[#allocation7 + $0x56c] ss:$16 sps:$4 sm:$0xff]   ;;  %v5150_v63 = vld [vmem:[#allocation7 + $0x368] ss:$16 sps:$4 sm:$0xff]  }
 0x14f   :  { %v5153_v0 = vld [vmem:[#allocation7 + $0x568] ss:$16 sps:$4 sm:$0xff]  }
 0x150   :  { %v5867_v6 = vpop.f32.mrf.mxu0  ;;  %v5869_v7 = vpop.f32.mrf.mxu1  ;;  %2578 = vmatmul.mubr.bf16.vlgmr.msra.gmra.mxu0 %v5865_v1  ;;  %2619 = vmatmul.mubr.bf16.vlgmr.msra.gmra.mxu1 %v5823_v40  ;;  %v5090_v40 = vld [vmem:[#allocation7 + $0x2a8] ss:$16 sps:$4 sm:$0xff]  }
 0x151   :  { %2628 = vmatpush1.bf16.msra.mxu0 %v5078_v2  ;;  %2669 = vmatpush1.bf16.msra.mxu1 %v5081_v3  ;;  %v5158_v2 = vld [vmem:[#allocation7 + $0x34c] ss:$16 sps:$4 sm:$0xff]  }
 0x152   :  { %v5873_v10 = vpop.f32.mrf.mxu0  ;;  %v5875_v9 = vpop.f32.mrf.mxu1  ;;  %2629 = vmatprep.subr.bf16.mxu0 %v5086_v4  ;;  %2670 = vmatprep.subr.bf16.mxu1 %v5089_v5  ;;  %v5161_v3 = vld [vmem:[#allocation7 + $0x54c] ss:$16 sps:$4 sm:$0xff]   ;;  %v5156_v4 = vld [vmem:[#allocation7 + $0x348] ss:$16 sps:$4 sm:$0xff]  }
 0x153   :  { %2659 = vmatprep.mubr.bf16.mxu0 %v5817_v11  ;;  %2700 = vmatprep.mubr.bf16.mxu1 %v5835_v57  ;;  %v5104_v11 = vld [vmem:[#allocation7 + $0x26c] ss:$16 sps:$4 sm:$0xff]   ;;  %v5159_v5 = vld [vmem:[#allocation7 + $0x548] ss:$16 sps:$4 sm:$0xff]  }
 0x154   :  { %v702_v14 = vpop.f32.mrf.mxu0  ;;  %v743_v15 = vpop.f32.mrf.mxu1  ;;  %v5107_v57 = vld [vmem:[#allocation7 + $0x46c] ss:$16 sps:$4 sm:$0xff]  }
 0x155   :  { %2630 = vmatpush1.bf16.msra.mxu0 %v5084_v52  ;;  %2671 = vmatpush1.bf16.msra.mxu1 %v5087_v8  ;;  %v5164_v52 = vld [vmem:[#allocation7 + $0x32c] ss:$16 sps:$4 sm:$0xff]  }
 0x156   :  { %v703_v17 = vpop.f32.mrf.mxu0  ;;  %v744_v18 = vpop.f32.mrf.mxu1  ;;  %2631 = vmatprep.subr.bf16.mxu0 %v5092_v12  ;;  %2672 = vmatprep.subr.bf16.mxu1 %v5095_v13  ;;  %v5167_v8 = vld [vmem:[#allocation7 + $0x52c] ss:$16 sps:$4 sm:$0xff]   ;;  %v5162_v12 = vld [vmem:[#allocation7 + $0x328] ss:$16 sps:$4 sm:$0xff]  }
 0x157   :  { %v5165_v13 = vld [vmem:[#allocation7 + $0x528] ss:$16 sps:$4 sm:$0xff]   ;;  %v5170_v14 = vld [vmem:[#allocation7 + $0x30c] ss:$16 sps:$4 sm:$0xff]  }
 0x158   :  { %v5173_v15 = vld [vmem:[#allocation7 + $0x50c] ss:$16 sps:$4 sm:$0xff]  }
 0x159   :  { %2632 = vmatpush1.bf16.msra.mxu0 %v5090_v40  ;;  %2673 = vmatpush1.bf16.msra.mxu1 %v5093_v16  ;;  %v5168_v40 = vld [vmem:[#allocation7 + $0x308] ss:$16 sps:$4 sm:$0xff]   ;;  %v5176_v17 = vld [vmem:[#allocation7 + $0x6ec] ss:$16 sps:$4 sm:$0xff]  }
 0x15a   :  { %2633 = vmatprep.subr.bf16.mxu0 %v5098_v19  ;;  %2674 = vmatprep.subr.bf16.mxu1 %v5101_v20  ;;  %v5171_v16 = vld [vmem:[#allocation7 + $0x508] ss:$16 sps:$4 sm:$0xff]   ;;  %v5179_v18 = vld [vmem:[#allocation7 + $0x8ec] ss:$16 sps:$4 sm:$0xff]  }
 0x15b   :  { %v5174_v19 = vld [vmem:[#allocation7 + $0x6e8] ss:$16 sps:$4 sm:$0xff]  }
 0x15c   :  { %v5177_v20 = vld [vmem:[#allocation7 + $0x8e8] ss:$16 sps:$4 sm:$0xff]  }
 0x15d   :  { %2634 = vmatpush1.bf16.msra.mxu0 %v5096_v21  ;;  %2675 = vmatpush1.bf16.msra.mxu1 %v5099_v22  ;;  %v5182_v21 = vld [vmem:[#allocation7 + $0x6cc] ss:$16 sps:$4 sm:$0xff]  }
 0x15e   :  { %2635 = vmatprep.subr.bf16.mxu0 %v5104_v11  ;;  %2676 = vmatprep.subr.bf16.mxu1 %v5107_v57  ;;  %v5185_v22 = vld [vmem:[#allocation7 + $0x8cc] ss:$16 sps:$4 sm:$0xff]  }
 0x161   :  { %2636 = vmatpush1.bf16.msra.mxu0 %v5102_v23  ;;  %2677 = vmatpush1.bf16.msra.mxu1 %v5105_v24  ;;  %v5180_v23 = vld [vmem:[#allocation7 + $0x6c8] ss:$16 sps:$4 sm:$0xff]  }
 0x162   :  { %2637 = vmatprep.subr.bf16.mxu0 %v5110_v25  ;;  %2678 = vmatprep.subr.bf16.mxu1 %v5113_v26  ;;  %v5183_v25 = vld [vmem:[#allocation7 + $0x8c8] ss:$16 sps:$4 sm:$0xff]   ;;  %v5188_v26 = vld [vmem:[#allocation7 + $0x6ac] ss:$16 sps:$4 sm:$0xff]  }
 0x165   :  { %2638 = vmatpush1.bf16.msra.mxu0 %v5108_v27  ;;  %2679 = vmatpush1.bf16.msra.mxu1 %v5111_v28 }
 0x166   :  { %2639 = vmatprep.subr.bf16.mxu0 %v5116_v29  ;;  %2680 = vmatprep.subr.bf16.mxu1 %v5119_v30  ;;  %v5191_v29 = vld [vmem:[#allocation7 + $0x8ac] ss:$16 sps:$4 sm:$0xff]  }
 0x169   :  { %2640 = vmatpush1.bf16.msra.mxu0 %v5114_v31  ;;  %2681 = vmatpush1.bf16.msra.mxu1 %v5117_v32  ;;  %v5186_v32 = vld [vmem:[#allocation7 + $0x6a8] ss:$16 sps:$4 sm:$0xff]  }
 0x16a   :  { %2641 = vmatprep.subr.bf16.mxu0 %v5122_v33  ;;  %2682 = vmatprep.subr.bf16.mxu1 %v5125_v34  ;;  %v5194_v34 = vld [vmem:[#allocation7 + $0x68c] ss:$16 sps:$4 sm:$0xff]  }
 0x16d   :  { %2642 = vmatpush1.bf16.msra.mxu0 %v5120_v35  ;;  %2683 = vmatpush1.bf16.msra.mxu1 %v5123_v36 }
 0x16e   :  { %2643 = vmatprep.subr.bf16.mxu0 %v5128_v37  ;;  %2684 = vmatprep.subr.bf16.mxu1 %v5131_v38  ;;  %v5197_v37 = vld [vmem:[#allocation7 + $0x88c] ss:$16 sps:$4 sm:$0xff]   ;;  %v5192_v38 = vld [vmem:[#allocation7 + $0x688] ss:$16 sps:$4 sm:$0xff]  }
 0x171   :  { %2644 = vmatpush2.bf16.msra.mxu0 %v5126_v39  ;;  %2685 = vmatpush2.bf16.msra.mxu1 %v5129_v42  ;;  %v5200_v39 = vld [vmem:[#allocation7 + $0x66c] ss:$16 sps:$4 sm:$0xff]   ;;  %v5201_v42 = vld [vmem:[#allocation7 + $0x868] ss:$16 sps:$4 sm:$0xff]  }
 0x172   :  { %2645 = vmatprep.subr.bf16.mxu0 %v5134_v43  ;;  %2686 = vmatprep.subr.bf16.mxu1 %v5137_v44  ;;  %v5206_v43 = vld [vmem:[#allocation7 + $0x64c] ss:$16 sps:$4 sm:$0xff]  }
 0x173   :  { %v5209_v44 = vld [vmem:[#allocation7 + $0x84c] ss:$16 sps:$4 sm:$0xff]  }
 0x175   :  { %2646 = vmatpush2.bf16.msra.mxu0 %v5132_v45  ;;  %2687 = vmatpush2.bf16.msra.mxu1 %v5135_v46  ;;  %v5204_v45 = vld [vmem:[#allocation7 + $0x648] ss:$16 sps:$4 sm:$0xff]  }
 0x176   :  { %2647 = vmatprep.subr.bf16.mxu0 %v5140_v47  ;;  %2688 = vmatprep.subr.bf16.mxu1 %v5143_v48  ;;  %v5207_v46 = vld [vmem:[#allocation7 + $0x848] ss:$16 sps:$4 sm:$0xff]   ;;  %v5212_v47 = vld [vmem:[#allocation7 + $0x62c] ss:$16 sps:$4 sm:$0xff]  }
 0x177   :  { %v5215_v48 = vld [vmem:[#allocation7 + $0x82c] ss:$16 sps:$4 sm:$0xff]  }
 0x179   :  { %2648 = vmatpush2.bf16.msra.mxu0 %v5138_v49  ;;  %2689 = vmatpush2.bf16.msra.mxu1 %v5141_v53  ;;  %v5210_v49 = vld [vmem:[#allocation7 + $0x628] ss:$16 sps:$4 sm:$0xff]  }
 0x17a   :  { %2649 = vmatprep.subr.bf16.mxu0 %v5146_v54  ;;  %2690 = vmatprep.subr.bf16.mxu1 %v5149_v55  ;;  %v5213_v53 = vld [vmem:[#allocation7 + $0x828] ss:$16 sps:$4 sm:$0xff]   ;;  %v5218_v54 = vld [vmem:[#allocation7 + $0x60c] ss:$16 sps:$4 sm:$0xff]  }
 0x17b   :  { %v5221_v55 = vld [vmem:[#allocation7 + $0x80c] ss:$16 sps:$4 sm:$0xff]  }
 0x17d   :  { %2650 = vmatpush2.bf16.msra.mxu0 %v5144_v59  ;;  %2691 = vmatpush2.bf16.msra.mxu1 %v5147_v56  ;;  %v5216_v59 = vld [vmem:[#allocation7 + $0x608] ss:$16 sps:$4 sm:$0xff]  }
 0x17e   :  { %2651 = vmatprep.subr.bf16.mxu0 %v5152_v58  ;;  %2692 = vmatprep.subr.bf16.mxu1 %v5155_v62  ;;  %v5219_v56 = vld [vmem:[#allocation7 + $0x808] ss:$16 sps:$4 sm:$0xff]   ;;  %v5224_v58 = vld [vmem:[#allocation7 + $0x7ec] ss:$16 sps:$4 sm:$0xff]  }
 0x17f   :  { %v5227_v62 = vld [vmem:[#allocation7 + $0x9ec] ss:$16 sps:$4 sm:$0xff]  }
 0x181   :  { %2652 = vmatpush2.bf16.msra.mxu0 %v5150_v63  ;;  %2693 = vmatpush2.bf16.msra.mxu1 %v5153_v0  ;;  %v5222_v63 = vld [vmem:[#allocation7 + $0x7e8] ss:$16 sps:$4 sm:$0xff]  }
 0x182   :  { %2653 = vmatprep.subr.bf16.mxu0 %v5158_v2  ;;  %2694 = vmatprep.subr.bf16.mxu1 %v5161_v3  ;;  %v5225_v0 = vld [vmem:[#allocation7 + $0x9e8] ss:$16 sps:$4 sm:$0xff]   ;;  %v5230_v2 = vld [vmem:[#allocation7 + $0x7cc] ss:$16 sps:$4 sm:$0xff]  }
 0x183   :  { %v5233_v3 = vld [vmem:[#allocation7 + $0x9cc] ss:$16 sps:$4 sm:$0xff]  }
 0x185   :  { %2654 = vmatpush2.bf16.msra.mxu0 %v5156_v4  ;;  %2695 = vmatpush2.bf16.msra.mxu1 %v5159_v5  ;;  %v5228_v4 = vld [vmem:[#allocation7 + $0x7c8] ss:$16 sps:$4 sm:$0xff]  }
 0x186   :  { %2655 = vmatprep.subr.bf16.mxu0 %v5164_v52  ;;  %2696 = vmatprep.subr.bf16.mxu1 %v5167_v8  ;;  %v5231_v5 = vld [vmem:[#allocation7 + $0x9c8] ss:$16 sps:$4 sm:$0xff]   ;;  %v5236_v52 = vld [vmem:[#allocation7 + $0x7ac] ss:$16 sps:$4 sm:$0xff]  }
 0x187   :  { %v5239_v8 = vld [vmem:[#allocation7 + $0x9ac] ss:$16 sps:$4 sm:$0xff]  }
 0x189   :  { %2656 = vmatpush2.bf16.msra.mxu0 %v5162_v12  ;;  %2697 = vmatpush2.bf16.msra.mxu1 %v5165_v13  ;;  %v5234_v12 = vld [vmem:[#allocation7 + $0x7a8] ss:$16 sps:$4 sm:$0xff]  }
 0x18a   :  { %2657 = vmatprep.subr.bf16.mxu0 %v5170_v14  ;;  %2698 = vmatprep.subr.bf16.mxu1 %v5173_v15  ;;  %v5237_v13 = vld [vmem:[#allocation7 + $0x9a8] ss:$16 sps:$4 sm:$0xff]   ;;  %v5242_v14 = vld [vmem:[#allocation7 + $0x78c] ss:$16 sps:$4 sm:$0xff]  }
 0x18b   :  { %v5245_v15 = vld [vmem:[#allocation7 + $0x98c] ss:$16 sps:$4 sm:$0xff]  }
 0x18d   :  { %2658 = vmatpush2.bf16.msra.mxu0 %v5168_v40  ;;  %2699 = vmatpush2.bf16.msra.mxu1 %v5171_v16  ;;  %v5240_v40 = vld [vmem:[#allocation7 + $0x788] ss:$16 sps:$4 sm:$0xff]  }
 0x18e   :  { %2709 = vmatprep.subr.bf16.mxu0 %v5176_v17  ;;  %2750 = vmatprep.subr.bf16.mxu1 %v5179_v18  ;;  %v5243_v16 = vld [vmem:[#allocation7 + $0x988] ss:$16 sps:$4 sm:$0xff]   ;;  %v5248_v17 = vld [vmem:[#allocation7 + $0x76c] ss:$16 sps:$4 sm:$0xff]  }
 0x18f   :  { %v5251_v18 = vld [vmem:[#allocation7 + $0x96c] ss:$16 sps:$4 sm:$0xff]  }
 0x190   :  { %v2415_v11 = vpop.f32.mrf.mxu0  ;;  %v2456_v57 = vpop.f32.mrf.mxu1  ;;  %2660 = vmatmul.mubr.bf16.vlgmr.msra.gmra.mxu0 %v5827_v41  ;;  %2701 = vmatmul.mubr.bf16.vlgmr.msra.gmra.mxu1 %v5847_v50  ;;  %v5189_v41 = vld [vmem:[#allocation7 + $0x8a8] ss:$16 sps:$4 sm:$0xff]  }
 0x191   :  { %v2416_v24 = vadd.f32 %v2415_v11, %v5867_v6  ;;  %2710 = vmatpush1.bf16.msra.mxu0 %v5174_v19  ;;  %2751 = vmatpush1.bf16.msra.mxu1 %v5177_v20  ;;  %v5246_v19 = vld [vmem:[#allocation7 + $0x768] ss:$16 sps:$4 sm:$0xff]  }
 0x192   :  { %v2417_v27 = vpop.f32.mrf.mxu0  ;;  %v2458_v28 = vpop.f32.mrf.mxu1  ;;  %2711 = vmatprep.subr.bf16.mxu0 %v5182_v21  ;;  %2752 = vmatprep.subr.bf16.mxu1 %v5185_v22  ;;  %v5249_v20 = vld [vmem:[#allocation7 + $0x968] ss:$16 sps:$4 sm:$0xff]   ;;  %v5254_v21 = vld [vmem:[#allocation7 + $0x74c] ss:$16 sps:$4 sm:$0xff]  }
 0x193   :  { %v5882_v30 = vadd.f32 %v2456_v57, %v2416_v24  ;;  %v2418_v31 = vadd.f32 %v2417_v27, %v5873_v10  ;;  %2741 = vmatprep.mubr.bf16.mxu0 %v5841_v61  ;;  %2782 = vmatprep.mubr.bf16.mxu1 %v5857_v60  ;;  %v5195_v10 = vld [vmem:[#allocation7 + $0x888] ss:$16 sps:$4 sm:$0xff]   ;;  %v5203_v61 = vld [vmem:[#allocation7 + $0x86c] ss:$16 sps:$4 sm:$0xff]  }
 0x194   :  { %v2419_v50 = vpop.f32.mrf.mxu0  ;;  %v2460_v6 = vpop.f32.mrf.mxu1  ;;  %v5198_v60 = vld [vmem:[#allocation7 + $0x668] ss:$16 sps:$4 sm:$0xff]   ;;  %v5257_v22 = vld [vmem:[#allocation7 + $0x94c] ss:$16 sps:$4 sm:$0xff]  }
 0x195   :  { %v5887_v33 = vadd.f32 %v2458_v28, %v2418_v31  ;;  %2712 = vmatpush1.bf16.msra.mxu0 %v5180_v23  ;;  %2753 = vmatpush1.bf16.msra.mxu1 %v5183_v25  ;;  %v5252_v11 = vld [vmem:[#allocation7 + $0x748] ss:$16 sps:$4 sm:$0xff]   ;;  %v5260_v23 = vld [vmem:[#allocation7 + $0x72c] ss:$16 sps:$4 sm:$0xff]  }
 0x196   :  { %v2420_v35 = vpop.f32.mrf.mxu0  ;;  %v2461_v36 = vpop.f32.mrf.mxu1  ;;  %2713 = vmatprep.subr.bf16.mxu0 %v5188_v26  ;;  %2754 = vmatprep.subr.bf16.mxu1 %v5191_v29  ;;  %v5255_v57 = vld [vmem:[#allocation7 + $0x948] ss:$16 sps:$4 sm:$0xff]   ;;  %v5263_v24 = vld [vmem:[#allocation7 + $0x92c] ss:$16 sps:$4 sm:$0xff]  }
 0x197   :  { %v5258_v25 = vld [vmem:[#allocation7 + $0x728] ss:$16 sps:$4 sm:$0xff]   ;;  %v5266_v27 = vld [vmem:[#allocation7 + $0x70c] ss:$16 sps:$4 sm:$0xff]   ;;  %v5273_v36 = vld [vmem:[#allocation11 + $0xc0] ss:$16 sps:$4 sm:$0xff]  }
 0x198   :  { %v5261_v26 = vld [vmem:[#allocation7 + $0x928] ss:$16 sps:$4 sm:$0xff]   ;;  %v5269_v28 = vld [vmem:[#allocation7 + $0x90c] ss:$16 sps:$4 sm:$0xff]  }
 0x199   :  { %2714 = vmatpush1.bf16.msra.mxu0 %v5186_v32  ;;  %2755 = vmatpush1.bf16.msra.mxu1 %v5189_v41  ;;  %v5264_v29 = vld [vmem:[#allocation7 + $0x708] ss:$16 sps:$4 sm:$0xff]   ;;  %v5270_v41 = vld [vmem:[#allocation11 + $0xe0] ss:$16 sps:$4 sm:$0xff]  }
 0x19a   :  { %2715 = vmatprep.subr.bf16.mxu0 %v5194_v34  ;;  %2756 = vmatprep.subr.bf16.mxu1 %v5197_v37  ;;  %v5267_v31 = vld [vmem:[#allocation7 + $0x908] ss:$16 sps:$4 sm:$0xff]  }
 0x19b   :  { %v5272_v32 = vld [vmem:[#allocation11 + $0xe4] ss:$16 sps:$4 sm:$0xff]  }
 0x19c   :  { %v5275_v50 = vld [vmem:[#allocation11 + $0xc4] ss:$16 sps:$4 sm:$0xff]  }
 0x19d   :  { %2716 = vmatpush1.bf16.msra.mxu0 %v5192_v38  ;;  %2757 = vmatpush1.bf16.msra.mxu1 %v5195_v10  ;;  %v5278_v10 = vld [vmem:[#allocation11 + $0xa4] ss:$16 sps:$4 sm:$0xff]  }
 0x19e   :  { %2717 = vmatprep.subr.bf16.mxu0 %v5200_v39  ;;  %2758 = vmatprep.subr.bf16.mxu1 %v5203_v61 }
 0x1a1   :  { %2718 = vmatpush1.bf16.msra.mxu0 %v5198_v60  ;;  %2759 = vmatpush1.bf16.msra.mxu1 %v5201_v42  ;;  %v5276_v42 = vld [vmem:[#allocation11 + $0xa0] ss:$16 sps:$4 sm:$0xff]  }
 0x1a2   :  { %2719 = vmatprep.subr.bf16.mxu0 %v5206_v43  ;;  %2760 = vmatprep.subr.bf16.mxu1 %v5209_v44  ;;  %v5284_v44 = vld [vmem:[#allocation11 + $0x64] ss:$16 sps:$4 sm:$0xff]  }
 0x1a5   :  { %2720 = vmatpush1.bf16.msra.mxu0 %v5204_v45  ;;  %2761 = vmatpush1.bf16.msra.mxu1 %v5207_v46  ;;  %v5366_v45 = vld [vmem:[#allocation11 + $0x2e0] ss:$16 sps:$4 sm:$0xff]   ;;  %v5368_v46 = vld [vmem:[#allocation11 + $0x2e4] ss:$16 sps:$4 sm:$0xff]  }
 0x1a6   :  { %2721 = vmatprep.subr.bf16.mxu0 %v5212_v47  ;;  %2762 = vmatprep.subr.bf16.mxu1 %v5215_v48  ;;  %v5282_v47 = vld [vmem:[#allocation11 + $0x60] ss:$16 sps:$4 sm:$0xff]   ;;  %v5371_v48 = vld [vmem:[#allocation11 + $0x2c4] ss:$16 sps:$4 sm:$0xff]  }
 0x1a9   :  { %2722 = vmatpush1.bf16.msra.mxu0 %v5210_v49  ;;  %2763 = vmatpush1.bf16.msra.mxu1 %v5213_v53  ;;  %v5287_v49 = vld [vmem:[#allocation11 + $0x44] ss:$16 sps:$4 sm:$0xff]   ;;  %v5369_v53 = vld [vmem:[#allocation11 + $0x2c0] ss:$16 sps:$4 sm:$0xff]  }
 0x1aa   :  { %2723 = vmatprep.subr.bf16.mxu0 %v5218_v54  ;;  %2764 = vmatprep.subr.bf16.mxu1 %v5221_v55  ;;  %v5374_v54 = vld [vmem:[#allocation11 + $0x2a4] ss:$16 sps:$4 sm:$0xff]   ;;  %v5285_v55 = vld [vmem:[#allocation11 + $0x40] ss:$16 sps:$4 sm:$0xff]  }
 0x1ad   :  { %2724 = vmatpush1.bf16.msra.mxu0 %v5216_v59  ;;  %2765 = vmatpush1.bf16.msra.mxu1 %v5219_v56  ;;  %v5290_v59 = vld [vmem:[#allocation11 + $0x24] ss:$16 sps:$4 sm:$0xff]   ;;  %v5372_v56 = vld [vmem:[#allocation11 + $0x2a0] ss:$16 sps:$4 sm:$0xff]  }
 0x1ae   :  { %2725 = vmatprep.subr.bf16.mxu0 %v5224_v58  ;;  %2766 = vmatprep.subr.bf16.mxu1 %v5227_v62  ;;  %v5377_v58 = vld [vmem:[#allocation11 + $0x284] ss:$16 sps:$4 sm:$0xff]   ;;  %v5288_v62 = vld [vmem:[#allocation11 + $0x20] ss:$16 sps:$4 sm:$0xff]  }
 0x1b1   :  { %2726 = vmatpush2.bf16.msra.mxu0 %v5222_v63  ;;  %2767 = vmatpush2.bf16.msra.mxu1 %v5225_v0  ;;  %v5293_v63 = vld [vmem:[#allocation11 + $0x4] ss:$16 sps:$4 sm:$0xff]   ;;  %v5375_v0 = vld [vmem:[#allocation11 + $0x280] ss:$16 sps:$4 sm:$0xff]  }
 0x1b2   :  { %2727 = vmatprep.subr.bf16.mxu0 %v5230_v2  ;;  %2768 = vmatprep.subr.bf16.mxu1 %v5233_v3  ;;  %v5380_v2 = vld [vmem:[#allocation11 + $0x264] ss:$16 sps:$4 sm:$0xff]   ;;  %v5291_v3 = vld [vmem:[#allocation11] ss:$16 sps:$4 sm:$0xff]  }
 0x1b5   :  { %2728 = vmatpush2.bf16.msra.mxu0 %v5228_v4  ;;  %2769 = vmatpush2.bf16.msra.mxu1 %v5231_v5  ;;  %v5296_v4 = vld [vmem:[#allocation11 + $0x1e4] ss:$16 sps:$4 sm:$0xff]   ;;  %v5378_v5 = vld [vmem:[#allocation11 + $0x260] ss:$16 sps:$4 sm:$0xff]  }
 0x1b6   :  { %2729 = vmatprep.subr.bf16.mxu0 %v5236_v52  ;;  %2770 = vmatprep.subr.bf16.mxu1 %v5239_v8  ;;  %v5383_v52 = vld [vmem:[#allocation11 + $0x244] ss:$16 sps:$4 sm:$0xff]   ;;  %v5294_v8 = vld [vmem:[#allocation11 + $0x1e0] ss:$16 sps:$4 sm:$0xff]  }
 0x1b9   :  { %2730 = vmatpush2.bf16.msra.mxu0 %v5234_v12  ;;  %2771 = vmatpush2.bf16.msra.mxu1 %v5237_v13  ;;  %v5299_v12 = vld [vmem:[#allocation11 + $0x1c4] ss:$16 sps:$4 sm:$0xff]   ;;  %v5381_v13 = vld [vmem:[#allocation11 + $0x240] ss:$16 sps:$4 sm:$0xff]  }
 0x1ba   :  { %2731 = vmatprep.subr.bf16.mxu0 %v5242_v14  ;;  %2772 = vmatprep.subr.bf16.mxu1 %v5245_v15  ;;  %v5386_v14 = vld [vmem:[#allocation11 + $0x224] ss:$16 sps:$4 sm:$0xff]   ;;  %v5297_v15 = vld [vmem:[#allocation11 + $0x1c0] ss:$16 sps:$4 sm:$0xff]  }
 0x1bd   :  { %2732 = vmatpush2.bf16.msra.mxu0 %v5240_v40  ;;  %2773 = vmatpush2.bf16.msra.mxu1 %v5243_v16  ;;  %v5302_v40 = vld [vmem:[#allocation11 + $0x1a4] ss:$16 sps:$4 sm:$0xff]   ;;  %v5384_v16 = vld [vmem:[#allocation11 + $0x220] ss:$16 sps:$4 sm:$0xff]  }
 0x1be   :  { %2733 = vmatprep.subr.bf16.mxu0 %v5248_v17  ;;  %2774 = vmatprep.subr.bf16.mxu1 %v5251_v18  ;;  %v5389_v17 = vld [vmem:[#allocation11 + $0x204] ss:$16 sps:$4 sm:$0xff]   ;;  %v5300_v18 = vld [vmem:[#allocation11 + $0x1a0] ss:$16 sps:$4 sm:$0xff]  }
 0x1c1   :  { %2734 = vmatpush2.bf16.msra.mxu0 %v5246_v19  ;;  %2775 = vmatpush2.bf16.msra.mxu1 %v5249_v20  ;;  %v5305_v19 = vld [vmem:[#allocation11 + $0x184] ss:$16 sps:$4 sm:$0xff]   ;;  %v5387_v20 = vld [vmem:[#allocation11 + $0x200] ss:$16 sps:$4 sm:$0xff]  }
 0x1c2   :  { %2735 = vmatprep.subr.bf16.mxu0 %v5254_v21  ;;  %2776 = vmatprep.subr.bf16.mxu1 %v5257_v22  ;;  %v5392_v21 = vld [vmem:[#allocation11 + $0x3e4] ss:$16 sps:$4 sm:$0xff]   ;;  %v5303_v22 = vld [vmem:[#allocation11 + $0x180] ss:$16 sps:$4 sm:$0xff]  }
 0x1c5   :  { %2736 = vmatpush2.bf16.msra.mxu0 %v5252_v11  ;;  %2777 = vmatpush2.bf16.msra.mxu1 %v5255_v57  ;;  %v5308_v11 = vld [vmem:[#allocation11 + $0x164] ss:$16 sps:$4 sm:$0xff]   ;;  %v5390_v57 = vld [vmem:[#allocation11 + $0x3e0] ss:$16 sps:$4 sm:$0xff]  }
 0x1c6   :  { %2737 = vmatprep.subr.bf16.mxu0 %v5260_v23  ;;  %2778 = vmatprep.subr.bf16.mxu1 %v5263_v24  ;;  %v5395_v23 = vld [vmem:[#allocation11 + $0x3c4] ss:$16 sps:$4 sm:$0xff]   ;;  %v5306_v24 = vld [vmem:[#allocation11 + $0x160] ss:$16 sps:$4 sm:$0xff]  }
 0x1c9   :  { %2738 = vmatpush2.bf16.msra.mxu0 %v5258_v25  ;;  %2779 = vmatpush2.bf16.msra.mxu1 %v5261_v26  ;;  %v5311_v25 = vld [vmem:[#allocation11 + $0x144] ss:$16 sps:$4 sm:$0xff]   ;;  %v5393_v26 = vld [vmem:[#allocation11 + $0x3c0] ss:$16 sps:$4 sm:$0xff]  }
 0x1ca   :  { %2739 = vmatprep.subr.bf16.mxu0 %v5266_v27  ;;  %2780 = vmatprep.subr.bf16.mxu1 %v5269_v28  ;;  %v5398_v27 = vld [vmem:[#allocation11 + $0x3a4] ss:$16 sps:$4 sm:$0xff]   ;;  %v5309_v28 = vld [vmem:[#allocation11 + $0x140] ss:$16 sps:$4 sm:$0xff]  }
 0x1cd   :  { %2740 = vmatpush2.bf16.msra.mxu0 %v5264_v29  ;;  %2781 = vmatpush2.bf16.msra.mxu1 %v5267_v31  ;;  %v5314_v29 = vld [vmem:[#allocation11 + $0x124] ss:$16 sps:$4 sm:$0xff]   ;;  %v2793_v31 = vlaneseq }
 0x1ce   :  { %3615 = vmatprep.subr.bf16.mxu0 %v5272_v32  ;;  %3656 = vmatprep.subr.bf16.mxu1 %v5368_v46  ;;  %v5396_v32 = vld [vmem:[#allocation11 + $0x3a0] ss:$16 sps:$4 sm:$0xff]   ;;  %v5407_v46 = vld [vmem:[#allocation11 + $0x344] ss:$16 sps:$4 sm:$0xff]  }
 0x1d0   :  { %v2497_v6 = vpop.f32.mrf.mxu0  ;;  %v2538_v34 = vpop.f32.mrf.mxu1  ;;  %2742 = vmatmul.mubr.bf16.vlgmr.msra.gmra.mxu0 %v5851_v51  ;;  %2783 = vmatmul.mubr.bf16.vlgmr.msra.gmra.mxu1 %v5865_v1  ;;  %v5281_v1 = vld [vmem:[#allocation11 + $0x84] ss:$16 sps:$4 sm:$0xff]  }
 0x1d1   :  { %v2498_v35 = vadd.f32 %v2497_v6, %v5882_v30  ;;  %3616 = vmatpush1.bf16.msra.mxu0 %v5270_v41  ;;  %v5279_v30 = vld [vmem:[#allocation11 + $0x80] ss:$16 sps:$4 sm:$0xff]   ;;  %3657 = vmatpush1.bf16.msra.mxu1 %v5366_v45  ;;  %v5401_v41 = vld [vmem:[#allocation11 + $0x384] ss:$16 sps:$4 sm:$0xff]  }
 0x1d2   :  { %v5892_v37 = vpop.f32.mrf.mxu0  ;;  %v5894_v38 = vpop.f32.mrf.mxu1  ;;  %3617 = vmatprep.subr.bf16.mxu0 %v5275_v50  ;;  %3658 = vmatprep.subr.bf16.mxu1 %v5371_v48  ;;  %v5312_v50 = vld [vmem:[#allocation11 + $0x120] ss:$16 sps:$4 sm:$0xff]   ;;  %v5317_v6 = vld [vmem:[#allocation11 + $0x104] ss:$16 sps:$4 sm:$0xff]  }
 0x1d3   :  { %v5896_v39 = vadd.f32 %v2538_v34, %v2498_v35  ;;  %v5898_v34 = vshrl.u32 %v2793_v31, 7  ;;  %v5399_v35 = vld [vmem:[#allocation11 + $0x380] ss:$16 sps:$4 sm:$0xff]   ;;  %v5353_v31 = vld [vmem:[#allocation11 + $0x18c] ss:$16 sps:$4 sm:$0xff]  }
 0x1d4   :  { %v2501_v61 = vpop.f32.mrf.mxu0  ;;  %v2542_v60 = vpop.f32.mrf.mxu1 }
 0x1d5   :  { %3618 = vmatpush1.bf16.msra.mxu0 %v5273_v36  ;;  %3659 = vmatpush1.bf16.msra.mxu1 %v5369_v53  ;;  %v5404_v36 = vld [vmem:[#allocation11 + $0x364] ss:$16 sps:$4 sm:$0xff]   ;;  %v5320_v61 = vld [vmem:[#allocation11 + $0xec] ss:$16 sps:$4 sm:$0xff]   ;;  %v2795_v60 = vsub.s32 0, %v5898_v34 }
 0x1d6   :  { %v2502_v43 = vpop.f32.mrf.mxu0  ;;  %v2543_v51 = vpop.f32.mrf.mxu1  ;;  %3619 = vmatprep.subr.bf16.mxu0 %v5278_v10  ;;  %3660 = vmatprep.subr.bf16.mxu1 %v5374_v54  ;;  %v5315_v10 = vld [vmem:[#allocation11 + $0x100] ss:$16 sps:$4 sm:$0xff]  }
 0x1d7   :  { %v5901_v43 = vld [vmem:[#allocation10] sm:$0xf]  ;;  %v2500_v51 = vadd.f32 %v5892_v37, %v5887_v33  ;;  %v5405_v37 = vld [vmem:[#allocation11 + $0x340] ss:$16 sps:$4 sm:$0xff]  }
 0x1d9   :  { %3620 = vmatpush1.bf16.msra.mxu0 %v5276_v42  ;;  %3661 = vmatpush1.bf16.msra.mxu1 %v5372_v56  ;;  %v5402_v42 = vld [vmem:[#allocation11 + $0x360] ss:$16 sps:$4 sm:$0xff]  }
 0x1da   :  { %3621 = vmatprep.subr.bf16.mxu0 %v5281_v1  ;;  %3662 = vmatprep.subr.bf16.mxu1 %v5377_v58  ;;  %v2799_v1 = vsub.s32 1, %v5898_v34  ;;  %v5410_v58 = vld [vmem:[#allocation11 + $0x324] ss:$16 sps:$4 sm:$0xff]  }
 0x1dc   :  { %v2800_v33 = vrot.slane %v5901_v43, %v2799_v1 }
 0x1dd   :  { %3622 = vmatpush1.bf16.msra.mxu0 %v5279_v30  ;;  %3663 = vmatpush1.bf16.msra.mxu1 %v5375_v0  ;;  %v2796_v30 = vrot.slane %v5901_v43, %v2795_v60 }
 0x1de   :  { %3623 = vmatprep.subr.bf16.mxu0 %v5284_v44  ;;  %3664 = vmatprep.subr.bf16.mxu1 %v5380_v2 }
 0x1e1   :  { %3624 = vmatpush1.bf16.msra.mxu0 %v5282_v47  ;;  %3665 = vmatpush1.bf16.msra.mxu1 %v5378_v5  ;;  %v2541_v47 = vadd.f32 %v5894_v38, %v2500_v51  ;;  %v5318_v5 = vld [vmem:[#allocation11 + $0xe8] ss:$16 sps:$4 sm:$0xff]  }
 0x1e2   :  { %3625 = vmatprep.subr.bf16.mxu0 %v5287_v49  ;;  %3666 = vmatprep.subr.bf16.mxu1 %v5383_v52  ;;  %v5411_v52 = vld [vmem:[#allocation11 + $0x300] ss:$16 sps:$4 sm:$0xff]  }
 0x1e5   :  { %3626 = vmatpush1.bf16.msra.mxu0 %v5285_v55  ;;  %3667 = vmatpush1.bf16.msra.mxu1 %v5381_v13  ;;  %v5416_v13 = vld [vmem:[#allocation11 + $0x2ec] ss:$16 sps:$4 sm:$0xff]  }
 0x1e6   :  { %3627 = vmatprep.subr.bf16.mxu0 %v5290_v59  ;;  %3668 = vmatprep.subr.bf16.mxu1 %v5386_v14  ;;  %v5321_v14 = vld [vmem:[#allocation11 + $0xc8] ss:$16 sps:$4 sm:$0xff]  }
 0x1e9   :  { %3628 = vmatpush1.bf16.msra.mxu0 %v5288_v62  ;;  %3669 = vmatpush1.bf16.msra.mxu1 %v5384_v16  ;;  %v5329_v16 = vld [vmem:[#allocation11 + $0x8c] ss:$16 sps:$4 sm:$0xff]  }
 0x1ea   :  { %3629 = vmatprep.subr.bf16.mxu0 %v5293_v63  ;;  %3670 = vmatprep.subr.bf16.mxu1 %v5389_v17  ;;  %v5408_v63 = vld [vmem:[#allocation11 + $0x320] ss:$16 sps:$4 sm:$0xff]   ;;  %v5327_v17 = vld [vmem:[#allocation11 + $0x88] ss:$16 sps:$4 sm:$0xff]  }
 0x1ed   :  { %3630 = vmatpush1.bf16.msra.mxu0 %v5291_v3  ;;  %3671 = vmatpush1.bf16.msra.mxu1 %v5387_v20  ;;  %v5413_v3 = vld [vmem:[#allocation11 + $0x304] ss:$16 sps:$4 sm:$0xff]   ;;  %v5335_v20 = vld [vmem:[#allocation11 + $0x4c] ss:$16 sps:$4 sm:$0xff]  }
 0x1ee   :  { %3631 = vmatprep.subr.bf16.mxu0 %v5296_v4  ;;  %3672 = vmatprep.subr.bf16.mxu1 %v5392_v21  ;;  %v5333_v21 = vld [vmem:[#allocation11 + $0x48] ss:$16 sps:$4 sm:$0xff]  }
 0x1f1   :  { %3632 = vmatpush2.bf16.msra.mxu0 %v5294_v8  ;;  %3673 = vmatpush2.bf16.msra.mxu1 %v5390_v57  ;;  %v5341_v57 = vld [vmem:[#allocation11 + $0xc] ss:$16 sps:$4 sm:$0xff]  }
 0x1f2   :  { %3633 = vmatprep.subr.bf16.mxu0 %v5299_v12  ;;  %3674 = vmatprep.subr.bf16.mxu1 %v5395_v23  ;;  %v5323_v12 = vld [vmem:[#allocation11 + $0xcc] ss:$16 sps:$4 sm:$0xff]   ;;  %v5339_v23 = vld [vmem:[#allocation11 + $0x8] ss:$16 sps:$4 sm:$0xff]  }
 0x1f5   :  { %3634 = vmatpush2.bf16.msra.mxu0 %v5297_v15  ;;  %3675 = vmatpush2.bf16.msra.mxu1 %v5393_v26  ;;  %v5326_v15 = vld [vmem:[#allocation11 + $0xac] ss:$16 sps:$4 sm:$0xff]  }
 0x1f6   :  { %3635 = vmatprep.subr.bf16.mxu0 %v5302_v40  ;;  %3676 = vmatprep.subr.bf16.mxu1 %v5398_v27  ;;  %v5324_v40 = vld [vmem:[#allocation11 + $0xa8] ss:$16 sps:$4 sm:$0xff]   ;;  %v5347_v26 = vld [vmem:[#allocation11 + $0x1cc] ss:$16 sps:$4 sm:$0xff]  }
 0x1f7   :  { %v5345_v27 = vld [vmem:[#allocation11 + $0x1c8] ss:$16 sps:$4 sm:$0xff]  }
 0x1f9   :  { %3636 = vmatpush2.bf16.msra.mxu0 %v5300_v18  ;;  %3677 = vmatpush2.bf16.msra.mxu1 %v5396_v32  ;;  %v5332_v18 = vld [vmem:[#allocation11 + $0x6c] ss:$16 sps:$4 sm:$0xff]   ;;  %v5351_v32 = vld [vmem:[#allocation11 + $0x188] ss:$16 sps:$4 sm:$0xff]  }
 0x1fa   :  { %3637 = vmatprep.subr.bf16.mxu0 %v5305_v19  ;;  %3678 = vmatprep.subr.bf16.mxu1 %v5401_v41  ;;  %v5330_v19 = vld [vmem:[#allocation11 + $0x68] ss:$16 sps:$4 sm:$0xff]   ;;  %v5356_v41 = vld [vmem:[#allocation11 + $0x16c] ss:$16 sps:$4 sm:$0xff]  }
 0x1fd   :  { %3638 = vmatpush2.bf16.msra.mxu0 %v5303_v22  ;;  %3679 = vmatpush2.bf16.msra.mxu1 %v5399_v35  ;;  %v5338_v22 = vld [vmem:[#allocation11 + $0x2c] ss:$16 sps:$4 sm:$0xff]   ;;  %v5357_v35 = vld [vmem:[#allocation11 + $0x148] ss:$16 sps:$4 sm:$0xff]  }
 0x1fe   :  { %3639 = vmatprep.subr.bf16.mxu0 %v5308_v11  ;;  %3680 = vmatprep.subr.bf16.mxu1 %v5404_v36  ;;  %v5336_v11 = vld [vmem:[#allocation11 + $0x28] ss:$16 sps:$4 sm:$0xff]   ;;  %v5362_v36 = vld [vmem:[#allocation11 + $0x12c] ss:$16 sps:$4 sm:$0xff]  }
 0x201   :  { %3640 = vmatpush2.bf16.msra.mxu0 %v5306_v24  ;;  %3681 = vmatpush2.bf16.msra.mxu1 %v5402_v42  ;;  %v5344_v24 = vld [vmem:[#allocation11 + $0x1ec] ss:$16 sps:$4 sm:$0xff]  }
 0x202   :  { %3641 = vmatprep.subr.bf16.mxu0 %v5311_v25  ;;  %3682 = vmatprep.subr.bf16.mxu1 %v5407_v46  ;;  %v5342_v25 = vld [vmem:[#allocation11 + $0x1e8] ss:$16 sps:$4 sm:$0xff]  }
 0x205   :  { %3642 = vmatpush2.bf16.msra.mxu0 %v5309_v28  ;;  %3683 = vmatpush2.bf16.msra.mxu1 %v5405_v37  ;;  %v5350_v28 = vld [vmem:[#allocation11 + $0x1ac] ss:$16 sps:$4 sm:$0xff]  }
 0x206   :  { %3643 = vmatprep.subr.bf16.mxu0 %v5314_v29  ;;  %3684 = vmatprep.subr.bf16.mxu1 %v5410_v58  ;;  %v5348_v29 = vld [vmem:[#allocation11 + $0x1a8] ss:$16 sps:$4 sm:$0xff]  }
 0x209   :  { %3644 = vmatpush2.bf16.msra.mxu0 %v5312_v50  ;;  %3685 = vmatpush2.bf16.msra.mxu1 %v5408_v63  ;;  %v5354_v50 = vld [vmem:[#allocation11 + $0x168] ss:$16 sps:$4 sm:$0xff]  }
 0x20a   :  { %3645 = vmatprep.subr.bf16.mxu0 %v5317_v6  ;;  %3686 = vmatprep.subr.bf16.mxu1 %v5413_v3  ;;  %v5359_v6 = vld [vmem:[#allocation11 + $0x14c] ss:$16 sps:$4 sm:$0xff]  }
 0x20d   :  { %3646 = vmatpush2.bf16.msra.mxu0 %v5315_v10  ;;  %3687 = vmatpush2.bf16.msra.mxu1 %v5411_v52 }
 0x20e   :  { %3697 = vmatprep.subr.bf16.mxu0 %v5320_v61  ;;  %3738 = vmatprep.subr.bf16.mxu1 %v5416_v13 }
 0x210   :  { %v2579_v44 = vpop.f32.mrf.mxu0  ;;  %v5909_v45 = vpop.f32.mrf.mxu1 }
 0x211   :  { %v2580_v48 = vadd.f32 %v2579_v44, %v5896_v39  ;;  %v2621_v10 = vadd.f32 %v5909_v45, %v5869_v7 }
 0x212   :  { %v2581_v49 = vpop.f32.mrf.mxu0  ;;  %v5916_v53 = vpop.f32.mrf.mxu1 }
 0x213   :  { %v2813_v54 = vadd.f32 %v2796_v30, %v2580_v48  ;;  %v2582_v55 = vadd.f32 %v2581_v49, %v2541_v47  ;;  %v5360_v30 = vld [vmem:[#allocation11 + $0x128] ss:$16 sps:$4 sm:$0xff]   ;;  %v5365_v47 = vld [vmem:[#allocation11 + $0x10c] ss:$16 sps:$4 sm:$0xff]   ;;  %v2623_v7 = vadd.f32 %v5916_v53, %v5875_v9 }
 0x214   :  { %v2583_v59 = vpop.f32.mrf.mxu0  ;;  %v2624_v56 = vpop.f32.mrf.mxu1  ;;  %v5363_v49 = vld [vmem:[#allocation11 + $0x108] ss:$16 sps:$4 sm:$0xff]  }
 0x215   :  { %v2814_v62 = vadd.f32 %v2800_v33, %v2582_v55  ;;  %v2817_v38 = vmax.f32 %v2813_v54, 0.0  ;;  %v2803_v59 = vsub.s32 2, %v5898_v34  ;;  %v2807_v56 = vsub.s32 3, %v5898_v34 }
 0x216   :  { %v2584_v0 = vpop.f32.mrf.mxu0  ;;  %v2625_v39 = vpop.f32.mrf.mxu1 }
 0x217   :  { %v2818_v2 = vmax.f32 %v2814_v62, 0.0  ;;  %v5918_v8 = vpack.c.bf16 %v2817_v38, %v2817_v38  ;;  %v2804_v0 = vrot.slane %v5901_v43, %v2803_v59  ;;  %v2808_v9 = vrot.slane %v5901_v43, %v2807_v56  ;;  %v5417_v43 = vld [vmem:[#allocation11 + $0x2c8] ss:$16 sps:$4 sm:$0xff]  }
 0x219   :  { %v2822_v4 = vpack.c.bf16 %v2818_v2, %v2818_v2 }
 0x21b   :  { %3647 = vmatprep.mubr.bf16.mxu0 %v2822_v4 }
 0x21c   :  { %3648 = vmatmul.mubr.bf16.vlgmr.msra.gmra.mxu0 %v5918_v8 }
 0x21d   :  { %3698 = vmatpush1.bf16.msra.mxu0 %v5318_v5  ;;  %3729 = vmatprep.mubr.bf16.mxu0 %v2822_v4 }
 0x21e   :  { %3699 = vmatprep.subr.bf16.mxu0 %v5323_v12 }
 0x221   :  { %3700 = vmatpush1.bf16.msra.mxu0 %v5321_v14 }
 0x222   :  { %3701 = vmatprep.subr.bf16.mxu0 %v5326_v15 }
 0x225   :  { %3702 = vmatpush1.bf16.msra.mxu0 %v5324_v40 }
 0x226   :  { %3703 = vmatprep.subr.bf16.mxu0 %v5329_v16 }
 0x229   :  { %3704 = vmatpush1.bf16.msra.mxu0 %v5327_v17  ;;  %v5414_v17 = vld [vmem:[#allocation11 + $0x2e8] ss:$16 sps:$4 sm:$0xff]  }
 0x22a   :  { %3705 = vmatprep.subr.bf16.mxu0 %v5332_v18 }
 0x22d   :  { %3706 = vmatpush1.bf16.msra.mxu0 %v5330_v19  ;;  %v5419_v19 = vld [vmem:[#allocation11 + $0x2cc] ss:$16 sps:$4 sm:$0xff]  }
 0x22e   :  { %3707 = vmatprep.subr.bf16.mxu0 %v5335_v20  ;;  %v5422_v20 = vld [vmem:[#allocation11 + $0x2ac] ss:$16 sps:$4 sm:$0xff]  }
 0x231   :  { %3708 = vmatpush1.bf16.msra.mxu0 %v5333_v21  ;;  %v5462_v21 = vld [vmem:[#allocation14 + $0x78] sm:$0xff]  }
 0x232   :  { %3709 = vmatprep.subr.bf16.mxu0 %v5338_v22  ;;  %v5463_v22 = vld [vmem:[#allocation14 + $0x38] sm:$0xff]  }
 0x235   :  { %3710 = vmatpush1.bf16.msra.mxu0 %v5336_v11  ;;  %v5464_v11 = vld [vmem:[#allocation14 + $0x70] sm:$0xff]  }
 0x236   :  { %3711 = vmatprep.subr.bf16.mxu0 %v5341_v57  ;;  %v5420_v57 = vld [vmem:[#allocation11 + $0x2a8] ss:$16 sps:$4 sm:$0xff]  }
 0x239   :  { %3712 = vmatpush1.bf16.msra.mxu0 %v5339_v23  ;;  %v5425_v23 = vld [vmem:[#allocation11 + $0x28c] ss:$16 sps:$4 sm:$0xff]  }
 0x23a   :  { %3713 = vmatprep.subr.bf16.mxu0 %v5344_v24  ;;  %v5465_v24 = vld [vmem:[#allocation14 + $0x30] sm:$0xff]  }
 0x23d   :  { %3714 = vmatpush2.bf16.msra.mxu0 %v5342_v25  ;;  %v5466_v25 = vld [vmem:[#allocation14 + $0x68] sm:$0xff]  }
 0x23e   :  { %3715 = vmatprep.subr.bf16.mxu0 %v5347_v26  ;;  %v5423_v26 = vld [vmem:[#allocation11 + $0x288] ss:$16 sps:$4 sm:$0xff]  }
 0x241   :  { %3716 = vmatpush2.bf16.msra.mxu0 %v5345_v27  ;;  %v5428_v27 = vld [vmem:[#allocation11 + $0x26c] ss:$16 sps:$4 sm:$0xff]  }
 0x242   :  { %3717 = vmatprep.subr.bf16.mxu0 %v5350_v28  ;;  %v5467_v28 = vld [vmem:[#allocation14 + $0x28] sm:$0xff]  }
 0x245   :  { %3718 = vmatpush2.bf16.msra.mxu0 %v5348_v29  ;;  %v5468_v29 = vld [vmem:[#allocation14 + $0x60] sm:$0xff]  }
 0x246   :  { %3719 = vmatprep.subr.bf16.mxu0 %v5353_v31  ;;  %v5426_v31 = vld [vmem:[#allocation11 + $0x268] ss:$16 sps:$4 sm:$0xff]  }
 0x249   :  { %3720 = vmatpush2.bf16.msra.mxu0 %v5351_v32  ;;  %v5431_v32 = vld [vmem:[#allocation11 + $0x24c] ss:$16 sps:$4 sm:$0xff]  }
 0x24a   :  { %3721 = vmatprep.subr.bf16.mxu0 %v5356_v41  ;;  %v5469_v41 = vld [vmem:[#allocation14 + $0x20] sm:$0xff]  }
 0x24d   :  { %3722 = vmatpush2.bf16.msra.mxu0 %v5354_v50  ;;  %v5470_v50 = vld [vmem:[#allocation14 + $0x58] sm:$0xff]  }
 0x24e   :  { %3723 = vmatprep.subr.bf16.mxu0 %v5359_v6  ;;  %v5429_v6 = vld [vmem:[#allocation11 + $0x248] ss:$16 sps:$4 sm:$0xff]  }
 0x250   :  { %v2661_v61 = vpop.f32.mrf.mxu0  ;;  %v2702_v42 = vpop.f32.mrf.mxu1 }
 0x251   :  { %v2662_v51 = vadd.f32 %v2661_v61, %v2621_v10  ;;  %3724 = vmatpush2.bf16.msra.mxu0 %v5357_v35  ;;  %v5434_v35 = vld [vmem:[#allocation11 + $0x22c] ss:$16 sps:$4 sm:$0xff]   ;;  %v5472_v10 = vld [vmem:[#allocation14 + $0x50] sm:$0xff]  }
 0x252   :  { %v2663_v44 = vpop.f32.mrf.mxu0  ;;  %v2704_v46 = vpop.f32.mrf.mxu1  ;;  %3725 = vmatprep.subr.bf16.mxu0 %v5362_v36  ;;  %v5471_v36 = vld [vmem:[#allocation14 + $0x18] sm:$0xff]   ;;  %v5432_v61 = vld [vmem:[#allocation11 + $0x228] ss:$16 sps:$4 sm:$0xff]  }
 0x253   :  { %v2703_v48 = vadd.f32 %v2702_v42, %v2662_v51  ;;  %v2664_v45 = vadd.f32 %v2663_v44, %v2623_v7  ;;  %v5437_v42 = vld [vmem:[#allocation11 + $0x20c] ss:$16 sps:$4 sm:$0xff]   ;;  %v5473_v51 = vld [vmem:[#allocation14 + $0x10] sm:$0xff]  }
 0x254   :  { %v2665_v33 = vpop.f32.mrf.mxu0  ;;  %v2706_v37 = vpop.f32.mrf.mxu1  ;;  %v5440_v44 = vld [vmem:[#allocation11 + $0x3ec] ss:$16 sps:$4 sm:$0xff]   ;;  %v5450_v7 = vld [vmem:[#allocation11 + $0x368] ss:$16 sps:$4 sm:$0xff]  }
 0x255   :  { %3726 = vmatpush2.bf16.msra.mxu0 %v5360_v30  ;;  %v2705_v63 = vadd.f32 %v2704_v46, %v2664_v45  ;;  %v5435_v30 = vld [vmem:[#allocation11 + $0x208] ss:$16 sps:$4 sm:$0xff]   ;;  %v5446_v33 = vld [vmem:[#allocation11 + $0x3ac] ss:$16 sps:$4 sm:$0xff]  }
 0x256   :  { %v2666_v54 = vpop.f32.mrf.mxu0  ;;  %v2707_v55 = vpop.f32.mrf.mxu1  ;;  %3727 = vmatprep.subr.bf16.mxu0 %v5365_v47  ;;  %v5438_v46 = vld [vmem:[#allocation11 + $0x3e8] ss:$16 sps:$4 sm:$0xff]   ;;  %v5443_v47 = vld [vmem:[#allocation11 + $0x3cc] ss:$16 sps:$4 sm:$0xff]  }
 0x257   :  { %v5444_v37 = vld [vmem:[#allocation11 + $0x3a8] ss:$16 sps:$4 sm:$0xff]   ;;  %v5452_v55 = vld [vmem:[#allocation11 + $0x36c] ss:$16 sps:$4 sm:$0xff]  }
 0x258   :  { %v5447_v54 = vld [vmem:[#allocation11 + $0x388] ss:$16 sps:$4 sm:$0xff]   ;;  %v5455_v45 = vld [vmem:[#allocation11 + $0x34c] ss:$16 sps:$4 sm:$0xff]  }
 0x259   :  { %3728 = vmatpush2.bf16.msra.mxu0 %v5363_v49  ;;  %v5449_v49 = vld [vmem:[#allocation11 + $0x38c] ss:$16 sps:$4 sm:$0xff]  }
 0x25a   :  { %4673 = vmatprep.subr.bf16.mxu0 %v5462_v21 }
 0x25c   :  { %3730 = vmatmul.mubr.bf16.vlgmr.msra.gmra.mxu0 %v5918_v8 }
 0x25d   :  { %4674 = vmatpush3.bf16.msra.mxu0 %v5463_v22 }
 0x25e   :  { %4675 = vmatprep.subr.bf16.mxu0 %v5464_v11  ;;  %v5490_v11 = vld [vmem:[#allocation14 + $0xc8] sm:$0xff]  }
 0x261   :  { %4676 = vmatpush3.bf16.msra.mxu0 %v5465_v24 }
 0x262   :  { %4677 = vmatprep.subr.bf16.mxu0 %v5466_v25  ;;  %v5492_v25 = vld [vmem:[#allocation14 + $0xc0] sm:$0xff]  }
 0x265   :  { %4678 = vmatpush3.bf16.msra.mxu0 %v5467_v28 }
 0x266   :  { %4679 = vmatprep.subr.bf16.mxu0 %v5468_v29 }
 0x269   :  { %4680 = vmatpush3.bf16.msra.mxu0 %v5469_v41 }
 0x26a   :  { %4681 = vmatprep.subr.bf16.mxu0 %v5470_v50 }
 0x26d   :  { %4682 = vmatpush3.bf16.msra.mxu0 %v5471_v36 }
 0x26e   :  { %4683 = vmatprep.subr.bf16.mxu0 %v5472_v10 }
 0x271   :  { %4684 = vmatpush3.bf16.msra.mxu0 %v5473_v51 }
 0x290   :  { %v2743_v58 = vpop.f32.mrf.mxu0  ;;  %v2784_v62 = vpop.f32.mrf.mxu1 }
 0x291   :  { %v2744_v38 = vadd.f32 %v2743_v58, %v2703_v48  ;;  %v5441_v48 = vld [vmem:[#allocation11 + $0x3c8] ss:$16 sps:$4 sm:$0xff]  }
 0x292   :  { %v2745_v39 = vpop.f32.mrf.mxu0  ;;  %v2786_v2 = vpop.f32.mrf.mxu1  ;;  %v5453_v58 = vld [vmem:[#allocation11 + $0x348] ss:$16 sps:$4 sm:$0xff]  }
 0x293   :  { %v2785_v3 = vadd.f32 %v2784_v62, %v2744_v38  ;;  %v2746_v4 = vadd.f32 %v2745_v39, %v2705_v63  ;;  %v5458_v62 = vld [vmem:[#allocation11 + $0x32c] ss:$16 sps:$4 sm:$0xff]   ;;  %v5456_v63 = vld [vmem:[#allocation11 + $0x328] ss:$16 sps:$4 sm:$0xff]  }
 0x294   :  { %v2747_v53 = vpop.f32.mrf.mxu0  ;;  %v2788_v5 = vpop.f32.mrf.mxu1  ;;  %v5461_v38 = vld [vmem:[#allocation11 + $0x30c] ss:$16 sps:$4 sm:$0xff]  }
 0x295   :  { %v2815_v52 = vadd.f32 %v2804_v0, %v2785_v3  ;;  %v2787_v8 = vadd.f32 %v2786_v2, %v2746_v4  ;;  %v5459_v0 = vld [vmem:[#allocation11 + $0x308] ss:$16 sps:$4 sm:$0xff]   ;;  %v5474_v3 = vld [vmem:[#allocation14 + $0x48] sm:$0xff]  }
 0x296   :  { %v2748_v12 = vpop.f32.mrf.mxu0  ;;  %v2789_v13 = vpop.f32.mrf.mxu1  ;;  %4685 = vmatprep.subr.bf16.mxu0 %v5474_v3  ;;  %v5476_v5 = vld [vmem:[#allocation14 + $0x40] sm:$0xff]  }
 0x297   :  { %v2816_v14 = vadd.f32 %v2808_v9, %v2787_v8  ;;  %v2819_v15 = vmax.f32 %v2815_v52, 0.0  ;;  %v5475_v9 = vld [vmem:[#allocation14 + $0x8] sm:$0xff]   ;;  %v5477_v52 = vld [vmem:[#allocation14] sm:$0xff]   ;;  %v5478_v8 = vld [vmem:[#allocation14 + $0xf8] sm:$0xff]  }
 0x298   :  { %4686 = vmatpush3.bf16.msra.mxu0 %v5475_v9  ;;  %v5479_v12 = vld [vmem:[#allocation14 + $0xb8] sm:$0xff]   ;;  %v5480_v13 = vld [vmem:[#allocation14 + $0xf0] sm:$0xff]  }
 0x299   :  { %v2820_v40 = vmax.f32 %v2816_v14, 0.0  ;;  %v5934_v18 = vpack.c.bf16 %v2819_v15, %v2819_v15  ;;  %4687 = vmatprep.subr.bf16.mxu0 %v5476_v5  ;;  %v5481_v14 = vld [vmem:[#allocation14 + $0xb0] sm:$0xff]   ;;  %v5482_v15 = vld [vmem:[#allocation14 + $0xe8] sm:$0xff]  }
 0x29b   :  { %v2824_v16 = vpack.c.bf16 %v2820_v40, %v2820_v40  ;;  %v5483_v40 = vld [vmem:[#allocation14 + $0xa8] sm:$0xff]  }
 0x29c   :  { %4688 = vmatpush3.bf16.msra.mxu0 %v5477_v52 }
 0x29d   :  { %3688 = vmatprep.mubr.bf16.mxu1 %v2824_v16 }
 0x29e   :  { %3689 = vmatmul.mubr.bf16.vlgmr.msra.gmra.mxu1 %v5934_v18 }
 0x29f   :  { %3739 = vmatpush1.bf16.msra.mxu1 %v5414_v17  ;;  %3770 = vmatprep.mubr.bf16.mxu1 %v2824_v16  ;;  %v5484_v16 = vld [vmem:[#allocation14 + $0xe0] sm:$0xff]  }
 0x2a0   :  { %3740 = vmatprep.subr.bf16.mxu1 %v5419_v19  ;;  %v5485_v17 = vld [vmem:[#allocation14 + $0xa0] sm:$0xff]   ;;  %v5487_v19 = vld [vmem:[#allocation14 + $0x98] sm:$0xff]  }
 0x2a3   :  { %3741 = vmatpush1.bf16.msra.mxu1 %v5417_v43  ;;  %v5488_v43 = vld [vmem:[#allocation14 + $0xd0] sm:$0xff]  }
 0x2a4   :  { %3742 = vmatprep.subr.bf16.mxu1 %v5422_v20  ;;  %v5489_v20 = vld [vmem:[#allocation14 + $0x90] sm:$0xff]  }
 0x2a7   :  { %3743 = vmatpush1.bf16.msra.mxu1 %v5420_v57  ;;  %v5491_v57 = vld [vmem:[#allocation14 + $0x88] sm:$0xff]  }
 0x2a8   :  { %3744 = vmatprep.subr.bf16.mxu1 %v5425_v23 }
 0x2ab   :  { %3745 = vmatpush1.bf16.msra.mxu1 %v5423_v26  ;;  %v5493_v26 = vld [vmem:[#allocation14 + $0x80] sm:$0xff]  }
 0x2ac   :  { %3746 = vmatprep.subr.bf16.mxu1 %v5428_v27  ;;  %v2953_v27 = vld [vmem:[#allocation13] sm:$0xf] }
 0x2ad   :  { %v2958_v28 = vrot.slane %v2953_v27, %v2795_v60  ;;  %v2962_v29 = vrot.slane %v2953_v27, %v2799_v1  ;;  %v2966_v60 = vrot.slane %v2953_v27, %v2803_v59  ;;  %v2970_v1 = vrot.slane %v2953_v27, %v2807_v56  ;;  %v4640_v56 = vld [vmem:[#allocation16] ss:$0 sm:$0xff] }
 0x2af   :  { %3747 = vmatpush1.bf16.msra.mxu1 %v5426_v31 }
 0x2b0   :  { %3748 = vmatprep.subr.bf16.mxu1 %v5431_v32 }
 0x2b3   :  { %3749 = vmatpush1.bf16.msra.mxu1 %v5429_v6 }
 0x2b4   :  { %3750 = vmatprep.subr.bf16.mxu1 %v5434_v35 }
 0x2b7   :  { %3751 = vmatpush1.bf16.msra.mxu1 %v5432_v61 }
 0x2b8   :  { %3752 = vmatprep.subr.bf16.mxu1 %v5437_v42 }
 0x2bb   :  { %3753 = vmatpush1.bf16.msra.mxu1 %v5435_v30 }
 0x2bc   :  { %3754 = vmatprep.subr.bf16.mxu1 %v5440_v44 }
 0x2bf   :  { %3755 = vmatpush2.bf16.msra.mxu1 %v5438_v46 }
 0x2c0   :  { %3756 = vmatprep.subr.bf16.mxu1 %v5443_v47 }
 0x2c3   :  { %3757 = vmatpush2.bf16.msra.mxu1 %v5441_v48 }
 0x2c4   :  { %3758 = vmatprep.subr.bf16.mxu1 %v5446_v33 }
 0x2c7   :  { %3759 = vmatpush2.bf16.msra.mxu1 %v5444_v37 }
 0x2c8   :  { %3760 = vmatprep.subr.bf16.mxu1 %v5449_v49 }
 0x2cb   :  { %3761 = vmatpush2.bf16.msra.mxu1 %v5447_v54 }
 0x2cc   :  { %3762 = vmatprep.subr.bf16.mxu1 %v5452_v55 }
 0x2cf   :  { %3763 = vmatpush2.bf16.msra.mxu1 %v5450_v7 }
 0x2d0   :  { %3764 = vmatprep.subr.bf16.mxu1 %v5455_v45 }
 0x2d3   :  { %3765 = vmatpush2.bf16.msra.mxu1 %v5453_v58 }
 0x2d4   :  { %3766 = vmatprep.subr.bf16.mxu1 %v5458_v62 }
 0x2d7   :  { %3767 = vmatpush2.bf16.msra.mxu1 %v5456_v63 }
 0x2d8   :  { %3768 = vmatprep.subr.bf16.mxu1 %v5461_v38 }
 0x2db   :  { %3769 = vmatpush2.bf16.msra.mxu1 %v5459_v0 }
 0x2dc   :  { %v3649_v39 = vpop.f32.mrf.mxu0  ;;  %4695 = vmatprep.subr.bf16.mxu1 %v5478_v8 }
 0x2dd   :  { %v3650_v31 = vadd.f32 %v3649_v39, %v2958_v28 }
 0x2de   :  { %3771 = vmatmul.mubr.bf16.vlgmr.msra.gmra.mxu1 %v5934_v18  ;;  %v3651_v2 = vpop.f32.mrf.mxu0  ;;  %v5486_v18 = vld [vmem:[#allocation14 + $0xd8] sm:$0xff]  }
 0x2df   :  { %4696 = vmatpush3.bf16.msra.mxu1 %v5479_v12  ;;  %v3652_v41 = vadd.f32 %v3651_v2, %v2962_v29 }
 0x2e0   :  { %v3653_v4 = vpop.f32.mrf.mxu0  ;;  %4697 = vmatprep.subr.bf16.mxu1 %v5480_v13 }
 0x2e2   :  { %v3654_v53 = vpop.f32.mrf.mxu0 }
 0x2e3   :  { %4698 = vmatpush3.bf16.msra.mxu1 %v5481_v14 }
 0x2e4   :  { %4699 = vmatprep.subr.bf16.mxu1 %v5482_v15 }
 0x2e7   :  { %4700 = vmatpush3.bf16.msra.mxu1 %v5483_v40 }
 0x2e8   :  { %4701 = vmatprep.subr.bf16.mxu1 %v5484_v16 }
 0x2eb   :  { %4702 = vmatpush3.bf16.msra.mxu1 %v5485_v17 }
 0x2ec   :  { %4703 = vmatprep.subr.bf16.mxu1 %v5486_v18 }
 0x2ef   :  { %4704 = vmatpush3.bf16.msra.mxu1 %v5487_v19 }
 0x2f0   :  { %4705 = vmatprep.subr.bf16.mxu1 %v5488_v43 }
 0x2f3   :  { %4706 = vmatpush3.bf16.msra.mxu1 %v5489_v20 }
 0x2f4   :  { %4707 = vmatprep.subr.bf16.mxu1 %v5490_v11 }
 0x2f7   :  { %4708 = vmatpush3.bf16.msra.mxu1 %v5491_v57 }
 0x2f8   :  { %4709 = vmatprep.subr.bf16.mxu1 %v5492_v25 }
 0x2fb   :  { %4710 = vmatpush3.bf16.msra.mxu1 %v5493_v26 }
 0x31c   :  { %v3731_v21 = vpop.f32.mrf.mxu0 }
 0x31d   :  { %v3732_v44 = vadd.f32 %v3731_v21, %v2966_v60 }
 0x31e   :  { %v3733_v22 = vpop.f32.mrf.mxu0 }
 0x31f   :  { %v3734_v47 = vadd.f32 %v3733_v22, %v2970_v1 }
 0x320   :  { %v3735_v23 = vpop.f32.mrf.mxu0 }
 0x322   :  { %v3736_v24 = vpop.f32.mrf.mxu0 }
 0x35e   :  { %v3690_v32 = vpop.f32.mrf.mxu1 }
 0x35f   :  { %v3691_v50 = vadd.f32 %v3690_v32, %v3650_v31 }
 0x360   :  { %v3692_v6 = vpop.f32.mrf.mxu1 }
 0x361   :  { %v3693_v35 = vadd.f32 %v3692_v6, %v3652_v41  ;;  %v3779_v36 = vmax.f32 %v3691_v50, 0.0 }
 0x362   :  { %v3694_v10 = vpop.f32.mrf.mxu1 }
 0x363   :  { %v3780_v61 = vmax.f32 %v3693_v35, 0.0  ;;  %v3783_v30 = vpack.c.bf16 %v3779_v36, %v3779_v36 }
 0x364   :  { %v3695_v42 = vpop.f32.mrf.mxu1 }
 0x365   :  { %v3784_v51 = vpack.c.bf16 %v3780_v61, %v3780_v61 }
 0x367   :  { %4082 = vmatprep.mubr.bf16.mxu0 %v3784_v51 }
 0x368   :  { %4083 = vmatmul.mubr.bf16.vlgmr.msra.gmra.mxu0 %v3783_v30 }
 0x39e   :  { %v3772_v46 = vpop.f32.mrf.mxu1 }
 0x39f   :  { %v3773_v48 = vadd.f32 %v3772_v46, %v3732_v44 }
 0x3a0   :  { %v3774_v33 = vpop.f32.mrf.mxu1 }
 0x3a1   :  { %v3775_v37 = vadd.f32 %v3774_v33, %v3734_v47  ;;  %v3781_v49 = vmax.f32 %v3773_v48, 0.0 }
 0x3a2   :  { %v3776_v54 = vpop.f32.mrf.mxu1 }
 0x3a3   :  { %v3782_v55 = vmax.f32 %v3775_v37, 0.0  ;;  %v3785_v58 = vpack.c.bf16 %v3781_v49, %v3781_v49 }
 0x3a4   :  { %v3777_v7 = vpop.f32.mrf.mxu1 }
 0x3a5   :  { %v3786_v45 = vpack.c.bf16 %v3782_v55, %v3782_v55 }
 0x3a7   :  { %4122 = vmatprep.mubr.bf16.mxu1 %v3786_v45 }
 0x3a8   :  { %4123 = vmatmul.mubr.bf16.vlgmr.msra.gmra.mxu1 %v3785_v58 }
 0x428   :  { %v4689_v62 = vpop.f32.mrf.mxu0 }
 0x42a   :  { %v4690_v63 = vpop.f32.mrf.mxu0 }
 0x42b   :  { %v4691_v34 = vadd.f32 %v4690_v63, %v4689_v62 }
 0x42c   :  { %v4692_v59 = vpop.f32.mrf.mxu0 }
 0x42d   :  { %v4085_v2 = vadd.f32 %v4691_v34, %v4640_v56 }
 0x42e   :  { %v4693_v38 = vpop.f32.mrf.mxu0 }
 0x468   :  { %v4711_v0 = vpop.f32.mrf.mxu1 }
 0x46a   :  { %v4712_v39 = vpop.f32.mrf.mxu1 }
 0x46b   :  { %v4713_v3 = vadd.f32 %v4712_v39, %v4711_v0 }
 0x46c   :  { %v4714_v4 = vpop.f32.mrf.mxu1 }
 0x46d   :  { %v4125_v9 = vadd.f32 %v4713_v3, %v4085_v2 }
 0x46e   :  { %v4715_v53 = vpop.f32.mrf.mxu1 }
 0x46f   :  { %4130 = vst [vmem:[#allocation17] sm:$0xff] %v4125_v9 }
 0x470   :  { %5685 = shalt.err (!%p5682_p7)
}
 0x471   :  { %4140 = dma.vmem_to_hbm [thread:$0]  %s4138_s8, 128, %s5958_s9, [#allocation4]  }
 0x472   :  { %5704 = dma.done.wait [#allocation4], 128  }
 0x473   :  { %5705 = vsyncadd [#allocation4], 4294967168 }
 0x474   :  { %4144 = vsyncpa [#allocation3], 1 }
 0x475   :  { %4145 = vsyncpa [#allocation6], 1 }
 0x476   :  { %4146 = vsyncpa [#allocation9], 1 }
 0x477   :  { %4147 = vsyncpa [#allocation12], 1 }
 0x478   :  { %4148 = vsyncpa [#allocation15], 1 }
 0x479   :  { %4149 = vsyncpa [#allocation4], 1 }

</bundles_post_ra>
